<compile_context>
chip_gen: v5e
topology: v5e:2x2
jax: 0.10.0
libtpu: 0.0.40
codegen_flags: <defaults>
</compile_context>

<pallas_src>
import functools

import jax
import jax.numpy as jnp
from jax.experimental import pallas as pl
from jax.experimental.pallas import tpu as pltpu

HIDDEN = (64, 128, 256, 512, 512)
OUT_PAD = 128      # fused output head padded to one full lane width
BIAS_ROWS = 8      # sublane-aligned packed-bias buffer
BIAS_COLS = 512    # widest layer

_MAX_TILE = 2048   # rows per grid step at large batch
_MIN_SPLIT = 512   # below this many rows, a single tile (splitting would be
                   # overhead-dominated on single-TC v5e/v6e)


def _relu6(v):
    return jnp.clip(v, 0.0, 6.0)


def _round_up(n, m):
    return ((n + m - 1) // m) * m


def _choose_tiling(batch):
    """Pick (tile_b, padded_b) adaptively.

    Tiny/medium batch: one sublane-aligned tile with minimal padding.
    Large batch: the smallest even step count n >= 2 whose tile fits
    _MAX_TILE rows -> amortizes per-step overhead, keeps both v7x
    TensorCores busy, and wastes at most 8 rows of padding per step.
    """
    b8 = _round_up(max(batch, 1), 8)
    if b8 < _MIN_SPLIT:
        return b8, b8
    n = max(2, -(-b8 // _MAX_TILE))        # ceil(b8 / _MAX_TILE), at least 2
    if n % 2:                              # even step count -> balanced on v7x
        n += 1
    tile = _round_up(-(-batch // n), 8)    # round_up(ceil(batch / n), 8)
    return tile, n * tile


def dqn_kernel(x_ref, w1, w2, w3, w4, w5, wo, b_ref, out_ref):
    # b_ref: (8, 512) f32, row i holds the bias of layer i (zero padded).
    b = b_ref[...]
    x = x_ref[...]                         # already bf16 (cast in the wrapper)
    h = _relu6(jnp.dot(x, w1[...], preferred_element_type=jnp.float32)
               + b[0:1, 0:64])
    h = _relu6(jnp.dot(h.astype(jnp.bfloat16), w2[...],
                       preferred_element_type=jnp.float32) + b[1:2, 0:128])
    h = _relu6(jnp.dot(h.astype(jnp.bfloat16), w3[...],
                       preferred_element_type=jnp.float32) + b[2:3, 0:256])
    h = _relu6(jnp.dot(h.astype(jnp.bfloat16), w4[...],
                       preferred_element_type=jnp.float32) + b[3:4, 0:512])
    h = _relu6(jnp.dot(h.astype(jnp.bfloat16), w5[...],
                       preferred_element_type=jnp.float32) + b[4:5, 0:512])
    # Fused (and lane-padded) output head: one lane-dense store.
    out_ref[...] = (jnp.dot(h.astype(jnp.bfloat16), wo[...],
                            preferred_element_type=jnp.float32)
                    + b[5:6, 0:OUT_PAD]).astype(out_ref.dtype)


@functools.partial(jax.jit, static_argnames=("head_dims",))
def dqn_forward(x, weights, bias_packed, head_dims):
    """x: [B, input_dim] f32.  weights: 6 bf16 (in,out) arrays (last = fused head).
    bias_packed: (8, 512) f32.  Returns (out1 [B, d1], out2 [B, d2])."""
    out1_dim, out2_dim = head_dims
    B, input_dim = x.shape

    # Cast activations to bf16 in the wrapper: halves x HBM->VMEM traffic and
    # removes a per-tile VPU cast from the kernel prologue.
    x = x.astype(jnp.bfloat16)

    tile_b, padded_b = _choose_tiling(B)
    if padded_b != B:
        x = jnp.pad(x, ((0, padded_b - B), (0, 0)))
    grid = (padded_b // tile_b,)

    # Weights: constant block index across the batch grid -> loaded once,
    # resident in VMEM for the whole call.
    w_specs = [pl.BlockSpec(w.shape, lambda i: (0, 0)) for w in weights]

    # TODO(synk): for repeated tiny-batch inference (grid=(1,), tile_b=8) the
    # call is weight-DMA/launch latency bound; a cross-pallas_call weight
    # prefetch (P10 futures) or batching several inference steps per call
    # would be needed to go faster in that regime.

    fused = pl.pallas_call(
        dqn_kernel,
        out_shape=jax.ShapeDtypeStruct((padded_b, OUT_PAD), jnp.float32),
        grid=grid,
        in_specs=([pl.BlockSpec((tile_b, input_dim), lambda i: (i, 0))]
                  + w_specs
                  + [pl.BlockSpec((BIAS_ROWS, BIAS_COLS), lambda i: (0, 0))]),
        out_specs=pl.BlockSpec((tile_b, OUT_PAD), lambda i: (i, 0)),
        compiler_params=pltpu.CompilerParams(
            dimension_semantics=("parallel",),
            # 48 MiB: above v5e's 16 MiB default so 2048-row tiles never
            # spill, comfortably under v7x's 64 MiB physical VMEM.
            vmem_limit_bytes=48 * 1024 * 1024),
    )(x, *weights, bias_packed)

    out1 = fused[:B, :out1_dim]
    out2 = fused[:B, out1_dim:out1_dim + out2_dim]
    return out1, out2


def init_params(key, input_dim, out1_dim, out2_dim):
    """Deterministic synthetic init matching PyTorch Linear U(-1/sqrt(in), 1/sqrt(in)).

    Weights stored as (in, out) bf16; the two heads are fused+zero-padded into
    one (512, OUT_PAD) weight; all biases packed into one (8, 512) f32 buffer.
    (A real PyTorch checkpoint would be converted by transposing each (out,in)
    weight and filling the same packed structures, preserving the zero padding
    of the fused-head columns.)
    """
    assert out1_dim + out2_dim <= OUT_PAD
    dims = [(input_dim, 64), (64, 128), (128, 256), (256, 512), (512, 512),
            (512, out1_dim), (512, out2_dim)]
    ws, bs = [], []
    for i, (din, dout) in enumerate(dims):
        kw, kb, key = jax.random.split(jax.random.fold_in(key, i), 3)
        bound = 1.0 / float(din) ** 0.5
        ws.append(jax.random.uniform(kw, (din, dout), jnp.float32, -bound, bound))
        bs.append(jax.random.uniform(kb, (dout,), jnp.float32, -bound, bound))

    # Fuse the two heads and pad to a full 128-lane output.
    wo = jnp.zeros((512, OUT_PAD), jnp.float32)
    wo = wo.at[:, :out1_dim].set(ws[5])
    wo = wo.at[:, out1_dim:out1_dim + out2_dim].set(ws[6])
    bo = jnp.zeros((OUT_PAD,), jnp.float32)
    bo = bo.at[:out1_dim].set(bs[5])
    bo = bo.at[out1_dim:out1_dim + out2_dim].set(bs[6])

    weights = tuple(w.astype(jnp.bfloat16) for w in ws[:5]) + (wo.astype(jnp.bfloat16),)

    bias_packed = jnp.zeros((BIAS_ROWS, BIAS_COLS), jnp.float32)
    for i, b in enumerate(bs[:5]):
        bias_packed = bias_packed.at[i, :b.shape[0]].set(b)
    bias_packed = bias_packed.at[5, :OUT_PAD].set(bo)

    return weights, bias_packed, (out1_dim, out2_dim)


def dqn_reference(x, weights, bias_packed, head_dims):
    """Pure-JAX reference using the same bf16 weights (f32 math)."""
    w1, w2, w3, w4, w5, wo = [w.astype(jnp.float32) for w in weights]
    b = bias_packed
    out1_dim, out2_dim = head_dims
    h = _relu6(x @ w1 + b[0:1, :64])
    h = _relu6(h @ w2 + b[1:2, :128])
    h = _relu6(h @ w3 + b[2:3, :256])
    h = _relu6(h @ w4 + b[3:4, :512])
    h = _relu6(h @ w5 + b[4:5, :512])
    fused = h @ wo + b[5:6, :OUT_PAD]
    return fused[:, :out1_dim], fused[:, out1_dim:out1_dim + out2_dim]


if __name__ == "__main__":
    input_dim = 16
    output_dim_traffic_light = 4
    output_dim_on_off = 2

    key = jax.random.PRNGKey(0)
    kx, kp, kx2 = jax.random.split(key, 3)
    weights, bias_packed, head_dims = init_params(
        kp, input_dim, output_dim_traffic_light, output_dim_on_off)

    # Tiny-batch path (batch=2, single 8-row tile).
    batch = 2
    x = jax.random.normal(kx, (batch, input_dim), jnp.float32)
    out1, out2 = dqn_forward(x, weights, bias_packed, head_dims)
    jax.block_until_ready((out1, out2))

    ref1, ref2 = dqn_reference(x, weights, bias_packed, head_dims)
    assert out1.shape == (batch, output_dim_traffic_light)
    assert out2.shape == (batch, output_dim_on_off)
    # bf16 activations/weights inside the kernel vs f32-math reference.
    assert jnp.allclose(out1, ref1, atol=5e-2, rtol=5e-2)
    assert jnp.allclose(out2, ref2, atol=5e-2, rtol=5e-2)

    # Larger batch exercising the adaptive multi-step grid (B=600 -> 2 tiles
    # of 304 rows, parallel axis shards across v7x's two TensorCores).
    batch2 = 600
    x2 = jax.random.normal(kx2, (batch2, input_dim), jnp.float32)
    o1b, o2b = dqn_forward(x2, weights, bias_packed, head_dims)
    jax.block_until_ready((o1b, o2b))
    r1b, r2b = dqn_reference(x2, weights, bias_packed, head_dims)
    assert o1b.shape == (batch2, output_dim_traffic_light)
    assert o2b.shape == (batch2, output_dim_on_off)
    assert jnp.allclose(o1b, r1b, atol=5e-2, rtol=5e-2)
    assert jnp.allclose(o2b, r2b, atol=5e-2, rtol=5e-2)

    print("KERNEL_OK")
</pallas_src>

<mosaic_0001>
module attributes {stable_mosaic.version = 11 : i64} {
  func.func @dqn_kernel(%arg0: i32, %arg1: memref<8x16xbf16, #tpu.memory_space<vmem>>, %arg2: memref<16x64xbf16, #tpu.memory_space<vmem>>, %arg3: memref<64x128xbf16, #tpu.memory_space<vmem>>, %arg4: memref<128x256xbf16, #tpu.memory_space<vmem>>, %arg5: memref<256x512xbf16, #tpu.memory_space<vmem>>, %arg6: memref<512x512xbf16, #tpu.memory_space<vmem>>, %arg7: memref<512x128xbf16, #tpu.memory_space<vmem>>, %arg8: memref<8x512xf32, #tpu.memory_space<vmem>>, %arg9: memref<8x128xf32, #tpu.memory_space<vmem>>) attributes {dimension_semantics = [#tpu.dimension_semantics<parallel>], iteration_bounds = array<i64: 1>, scalar_prefetch = 0 : i64, scratch_operands = 0 : i64, tpu.core_type = #tpu.core_type<tc>, window_params = [{transform_indices = @transform_0, window_bounds = array<i64: 8, 16>}, {pipeline_mode = #tpu.pipeline_mode<synchronous>, transform_indices = @transform_1, window_bounds = array<i64: 16, 64>}, {pipeline_mode = #tpu.pipeline_mode<synchronous>, transform_indices = @transform_2, window_bounds = array<i64: 64, 128>}, {pipeline_mode = #tpu.pipeline_mode<synchronous>, transform_indices = @transform_3, window_bounds = array<i64: 128, 256>}, {pipeline_mode = #tpu.pipeline_mode<synchronous>, transform_indices = @transform_4, window_bounds = array<i64: 256, 512>}, {pipeline_mode = #tpu.pipeline_mode<synchronous>, transform_indices = @transform_5, window_bounds = array<i64: 512, 512>}, {pipeline_mode = #tpu.pipeline_mode<synchronous>, transform_indices = @transform_6, window_bounds = array<i64: 512, 128>}, {pipeline_mode = #tpu.pipeline_mode<synchronous>, transform_indices = @transform_7, window_bounds = array<i64: 8, 512>}, {transform_indices = @transform_8, window_bounds = array<i64: 8, 128>}]} {
    %c0 = arith.constant 0 : index
    %c0_0 = arith.constant 0 : index
    %0 = vector.load %arg8[%c0, %c0_0] : memref<8x512xf32, #tpu.memory_space<vmem>>, vector<8x512xf32>
    %c0_1 = arith.constant 0 : index
    %c0_2 = arith.constant 0 : index
    %1 = vector.load %arg1[%c0_1, %c0_2] : memref<8x16xbf16, #tpu.memory_space<vmem>>, vector<8x16xbf16>
    %c0_3 = arith.constant 0 : index
    %c0_4 = arith.constant 0 : index
    %2 = vector.load %arg2[%c0_3, %c0_4] : memref<16x64xbf16, #tpu.memory_space<vmem>>, vector<16x64xbf16>
    %cst = arith.constant dense<0.000000e+00> : vector<8x64xf32>
    %3 = tpu.matmul %1, %2, %cst {dimension_numbers = #tpu.dot_dimension_numbers<[1], [0], [0], [1], [0, 0, 1, 1], [], []>} : vector<8x16xbf16>, vector<16x64xbf16>, vector<8x64xf32> -> vector<8x64xf32>
    %4 = vector.extract_strided_slice %0 {offsets = [0, 0], sizes = [1, 64], strides = [1, 1]} : vector<8x512xf32> to vector<1x64xf32>
    %5 = vector.broadcast %4 : vector<1x64xf32> to vector<8x64xf32>
    %6 = arith.addf %3, %5 : vector<8x64xf32>
    %cst_5 = arith.constant 0.000000e+00 : f32
    %cst_6 = arith.constant 6.000000e+00 : f32
    %7 = vector.broadcast %cst_5 : f32 to vector<8x64xf32>
    %8 = arith.maximumf %7, %6 : vector<8x64xf32>
    %9 = vector.broadcast %cst_6 : f32 to vector<8x64xf32>
    %10 = arith.minimumf %9, %8 : vector<8x64xf32>
    %11 = arith.truncf %10 : vector<8x64xf32> to vector<8x64xbf16>
    %c0_7 = arith.constant 0 : index
    %c0_8 = arith.constant 0 : index
    %12 = vector.load %arg3[%c0_7, %c0_8] : memref<64x128xbf16, #tpu.memory_space<vmem>>, vector<64x128xbf16>
    %cst_9 = arith.constant dense<0.000000e+00> : vector<8x128xf32>
    %13 = tpu.matmul %11, %12, %cst_9 {dimension_numbers = #tpu.dot_dimension_numbers<[1], [0], [0], [1], [0, 0, 1, 1], [], []>} : vector<8x64xbf16>, vector<64x128xbf16>, vector<8x128xf32> -> vector<8x128xf32>
    %14 = vector.extract_strided_slice %0 {offsets = [1, 0], sizes = [1, 128], strides = [1, 1]} : vector<8x512xf32> to vector<1x128xf32>
    %15 = vector.broadcast %14 : vector<1x128xf32> to vector<8x128xf32>
    %16 = arith.addf %13, %15 : vector<8x128xf32>
    %cst_10 = arith.constant 0.000000e+00 : f32
    %cst_11 = arith.constant 6.000000e+00 : f32
    %17 = vector.broadcast %cst_10 : f32 to vector<8x128xf32>
    %18 = arith.maximumf %17, %16 : vector<8x128xf32>
    %19 = vector.broadcast %cst_11 : f32 to vector<8x128xf32>
    %20 = arith.minimumf %19, %18 : vector<8x128xf32>
    %21 = arith.truncf %20 : vector<8x128xf32> to vector<8x128xbf16>
    %c0_12 = arith.constant 0 : index
    %c0_13 = arith.constant 0 : index
    %22 = vector.load %arg4[%c0_12, %c0_13] : memref<128x256xbf16, #tpu.memory_space<vmem>>, vector<128x256xbf16>
    %cst_14 = arith.constant dense<0.000000e+00> : vector<8x256xf32>
    %23 = tpu.matmul %21, %22, %cst_14 {dimension_numbers = #tpu.dot_dimension_numbers<[1], [0], [0], [1], [0, 0, 1, 1], [], []>} : vector<8x128xbf16>, vector<128x256xbf16>, vector<8x256xf32> -> vector<8x256xf32>
    %24 = vector.extract_strided_slice %0 {offsets = [2, 0], sizes = [1, 256], strides = [1, 1]} : vector<8x512xf32> to vector<1x256xf32>
    %25 = vector.broadcast %24 : vector<1x256xf32> to vector<8x256xf32>
    %26 = arith.addf %23, %25 : vector<8x256xf32>
    %cst_15 = arith.constant 0.000000e+00 : f32
    %cst_16 = arith.constant 6.000000e+00 : f32
    %27 = vector.broadcast %cst_15 : f32 to vector<8x256xf32>
    %28 = arith.maximumf %27, %26 : vector<8x256xf32>
    %29 = vector.broadcast %cst_16 : f32 to vector<8x256xf32>
    %30 = arith.minimumf %29, %28 : vector<8x256xf32>
    %31 = arith.truncf %30 : vector<8x256xf32> to vector<8x256xbf16>
    %c0_17 = arith.constant 0 : index
    %c0_18 = arith.constant 0 : index
    %32 = vector.load %arg5[%c0_17, %c0_18] : memref<256x512xbf16, #tpu.memory_space<vmem>>, vector<256x512xbf16>
    %cst_19 = arith.constant dense<0.000000e+00> : vector<8x512xf32>
    %33 = tpu.matmul %31, %32, %cst_19 {dimension_numbers = #tpu.dot_dimension_numbers<[1], [0], [0], [1], [0, 0, 1, 1], [], []>} : vector<8x256xbf16>, vector<256x512xbf16>, vector<8x512xf32> -> vector<8x512xf32>
    %34 = vector.extract_strided_slice %0 {offsets = [3, 0], sizes = [1, 512], strides = [1, 1]} : vector<8x512xf32> to vector<1x512xf32>
    %35 = vector.broadcast %34 : vector<1x512xf32> to vector<8x512xf32>
    %36 = arith.addf %33, %35 : vector<8x512xf32>
    %cst_20 = arith.constant 0.000000e+00 : f32
    %cst_21 = arith.constant 6.000000e+00 : f32
    %37 = vector.broadcast %cst_20 : f32 to vector<8x512xf32>
    %38 = arith.maximumf %37, %36 : vector<8x512xf32>
    %39 = vector.broadcast %cst_21 : f32 to vector<8x512xf32>
    %40 = arith.minimumf %39, %38 : vector<8x512xf32>
    %41 = arith.truncf %40 : vector<8x512xf32> to vector<8x512xbf16>
    %c0_22 = arith.constant 0 : index
    %c0_23 = arith.constant 0 : index
    %42 = vector.load %arg6[%c0_22, %c0_23] : memref<512x512xbf16, #tpu.memory_space<vmem>>, vector<512x512xbf16>
    %cst_24 = arith.constant dense<0.000000e+00> : vector<8x512xf32>
    %43 = tpu.matmul %41, %42, %cst_24 {dimension_numbers = #tpu.dot_dimension_numbers<[1], [0], [0], [1], [0, 0, 1, 1], [], []>} : vector<8x512xbf16>, vector<512x512xbf16>, vector<8x512xf32> -> vector<8x512xf32>
    %44 = vector.extract_strided_slice %0 {offsets = [4, 0], sizes = [1, 512], strides = [1, 1]} : vector<8x512xf32> to vector<1x512xf32>
    %45 = vector.broadcast %44 : vector<1x512xf32> to vector<8x512xf32>
    %46 = arith.addf %43, %45 : vector<8x512xf32>
    %cst_25 = arith.constant 0.000000e+00 : f32
    %cst_26 = arith.constant 6.000000e+00 : f32
    %47 = vector.broadcast %cst_25 : f32 to vector<8x512xf32>
    %48 = arith.maximumf %47, %46 : vector<8x512xf32>
    %49 = vector.broadcast %cst_26 : f32 to vector<8x512xf32>
    %50 = arith.minimumf %49, %48 : vector<8x512xf32>
    %51 = arith.truncf %50 : vector<8x512xf32> to vector<8x512xbf16>
    %c0_27 = arith.constant 0 : index
    %c0_28 = arith.constant 0 : index
    %52 = vector.load %arg7[%c0_27, %c0_28] : memref<512x128xbf16, #tpu.memory_space<vmem>>, vector<512x128xbf16>
    %cst_29 = arith.constant dense<0.000000e+00> : vector<8x128xf32>
    %53 = tpu.matmul %51, %52, %cst_29 {dimension_numbers = #tpu.dot_dimension_numbers<[1], [0], [0], [1], [0, 0, 1, 1], [], []>} : vector<8x512xbf16>, vector<512x128xbf16>, vector<8x128xf32> -> vector<8x128xf32>
    %54 = vector.extract_strided_slice %0 {offsets = [5, 0], sizes = [1, 128], strides = [1, 1]} : vector<8x512xf32> to vector<1x128xf32>
    %55 = vector.broadcast %54 : vector<1x128xf32> to vector<8x128xf32>
    %56 = arith.addf %53, %55 : vector<8x128xf32>
    %c0_30 = arith.constant 0 : index
    %c0_31 = arith.constant 0 : index
    %57 = vector.load %arg9[%c0_30, %c0_31] : memref<8x128xf32, #tpu.memory_space<vmem>>, vector<8x128xf32>
    tpu.vector_store %arg9[%c0_30, %c0_31], %56 {strides = array<i32>} : memref<8x128xf32, #tpu.memory_space<vmem>>, vector<8x128xf32>,
    return
  }
  func.func @transform_0(%arg0: i32) -> (i32, i32) {
    %c0_i32 = arith.constant 0 : i32
    %c0_i32_0 = arith.constant 0 : i32
    return %arg0, %c0_i32 : i32, i32
  }
  func.func @transform_1(%arg0: i32) -> (i32, i32) {
    %c0_i32 = arith.constant 0 : i32
    %c0_i32_0 = arith.constant 0 : i32
    %c0_i32_1 = arith.constant 0 : i32
    return %c0_i32, %c0_i32_0 : i32, i32
  }
  func.func @transform_2(%arg0: i32) -> (i32, i32) {
    %c0_i32 = arith.constant 0 : i32
    %c0_i32_0 = arith.constant 0 : i32
    %c0_i32_1 = arith.constant 0 : i32
    return %c0_i32, %c0_i32_0 : i32, i32
  }
  func.func @transform_3(%arg0: i32) -> (i32, i32) {
    %c0_i32 = arith.constant 0 : i32
    %c0_i32_0 = arith.constant 0 : i32
    %c0_i32_1 = arith.constant 0 : i32
    return %c0_i32, %c0_i32_0 : i32, i32
  }
  func.func @transform_4(%arg0: i32) -> (i32, i32) {
    %c0_i32 = arith.constant 0 : i32
    %c0_i32_0 = arith.constant 0 : i32
    %c0_i32_1 = arith.constant 0 : i32
    return %c0_i32, %c0_i32_0 : i32, i32
  }
  func.func @transform_5(%arg0: i32) -> (i32, i32) {
    %c0_i32 = arith.constant 0 : i32
    %c0_i32_0 = arith.constant 0 : i32
    %c0_i32_1 = arith.constant 0 : i32
    return %c0_i32, %c0_i32_0 : i32, i32
  }
  func.func @transform_6(%arg0: i32) -> (i32, i32) {
    %c0_i32 = arith.constant 0 : i32
    %c0_i32_0 = arith.constant 0 : i32
    %c0_i32_1 = arith.constant 0 : i32
    return %c0_i32, %c0_i32_0 : i32, i32
  }
  func.func @transform_7(%arg0: i32) -> (i32, i32) {
    %c0_i32 = arith.constant 0 : i32
    %c0_i32_0 = arith.constant 0 : i32
    %c0_i32_1 = arith.constant 0 : i32
    return %c0_i32, %c0_i32_0 : i32, i32
  }
  func.func @transform_8(%arg0: i32) -> (i32, i32) {
    %c0_i32 = arith.constant 0 : i32
    %c0_i32_0 = arith.constant 0 : i32
    return %arg0, %c0_i32 : i32, i32
  }
}

</mosaic_0001>

<bundles_post_ra>
// kernel: dqn_forward.1
= control target key start
LH: loop header
LB: loop body
LE: loop exit
PB: predicated region body
PF: predicated region fallthrough
CT: control target
= control target key end

     0   :  { %13 = vsyncpa [#allocation3], 0  ;;  %s3688_s0 = inlined_call_operand.vmem [shape: bf16[8,16], index: 0, kind: input, shape index: {}]   ;;  %s3689_s1 = inlined_call_operand.vmem [shape: bf16[16,64], index: 1, kind: input, shape index: {}]   ;;  %s3690_s2 = inlined_call_operand.hbm [shape: bf16[64,128], index: 2, kind: input, shape index: {}]   ;;  %s3691_s3 = inlined_call_operand.hbm [shape: bf16[128,256], index: 3, kind: input, shape index: {}]   ;;  %s3692_s4 = inlined_call_operand.hbm [shape: bf16[256,512], index: 4, kind: input, shape index: {}]   ;;  %s3693_s5 = inlined_call_operand.hbm [shape: bf16[512,512], index: 5, kind: input, shape index: {}]   ;;  %s3694_s6 = inlined_call_operand.hbm [shape: bf16[512,128], index: 6, kind: input, shape index: {}]   ;;  %s3695_s7 = inlined_call_operand.hbm [shape: f32[8,512], index: 7, kind: input, shape index: {}]   ;;  %s3696_s8 = inlined_call_operand.vmem [shape: f32[8,128], index: 8, kind: output, shape index: {}]  }
   0x1   :  { %14 = vsyncpa [#allocation5], 0 }
   0x2   :  { %15 = vsyncpa [#allocation8], 0  ;;  %s38_s29 = sshll.u32 %s3691_s3, 4  ;;  %s39_s29 = int_to_ptr.hbm [resolvable:$true] %s38_s29 }
   0x3   :  { %16 = vsyncpa [#allocation11], 0  ;;  %s3546_s30 = smov [#allocation4]   ;;  %s3547_s10 = smov 128  }
   0x4   :  { %s40_s9 = sshll.u32 %s3546_s30, 4  ;;  %s3548_s11 = smov 8   ;;  %s41_s9 = int_to_ptr.vmem [resolvable:$true] %s40_s9 }
   0x5   :  { %46 = dma.hbm_to_vmem [thread:$0]  %s39_s29, 2048, %s41_s9, [#allocation5], %s3547_s10, %s3547_s10, %s3548_s11  }
   0x6   :  { %s64_s14 = sshll.u32 %s3693_s5, 4  ;;  %s3549_s15 = smov [#allocation7]   ;;  %s65_s14 = int_to_ptr.hbm [resolvable:$true] %s64_s14 }
   0x7   :  { %s66_s16 = sshll.u32 %s3549_s15, 4  ;;  %s25_s19 = sshll.u32 %s3690_s2, 4  ;;  %s67_s16 = int_to_ptr.vmem [resolvable:$true] %s66_s16  ;;  %s26_s19 = int_to_ptr.hbm [resolvable:$true] %s25_s19 }
   0x8   :  { %s3550_s3 = smov 256   ;;  %s3551_s20 = smov 16  }
   0x9   :  { %72 = dma.hbm_to_vmem [thread:$0]  %s65_s14, 16384, %s67_s16, [#allocation8], %s3550_s3, %s3550_s3, %s3551_s20  }
   0xa   :  { %s3552_s21 = smov [#allocation2]   ;;  %s51_s25 = sshll.u32 %s3692_s4, 4  ;;  %s52_s25 = int_to_ptr.hbm [resolvable:$true] %s51_s25 }
   0xb   :  { %s27_s22 = sshll.u32 %s3552_s21, 4  ;;  %s3553_s5 = smov 64   ;;  %s28_s22 = int_to_ptr.vmem [resolvable:$true] %s27_s22 }
   0xc   :  { %s3554_s26 = smov 4   ;;  %s3555_s27 = smov [#allocation6]  }
   0xd   :  { %33 = dma.hbm_to_vmem [thread:$0]  %s26_s19, 512, %s28_s22, [#allocation3], %s3553_s5, %s3553_s5, %s3554_s26  }
   0xe   :  { %s53_s28 = sshll.u32 %s3555_s27, 4  ;;  %s77_s30 = sshll.u32 %s3694_s6, 4  ;;  %s54_s28 = int_to_ptr.vmem [resolvable:$true] %s53_s28  ;;  %s78_s30 = int_to_ptr.hbm [resolvable:$true] %s77_s30 }
   0xf   :  { %59 = dma.hbm_to_vmem [thread:$0]  %s52_s25, 8192, %s54_s28, [#allocation5], %s3550_s3, %s3550_s3, %s3551_s20  }
  0x10   :  { %s91_s11 = sshll.u32 %s3695_s7, 4  ;;  %s3556_s12 = smov [#allocation9]   ;;  %s92_s11 = int_to_ptr.hbm [resolvable:$true] %s91_s11 }
  0x11   :  { %s79_s13 = sshll.u32 %s3556_s12, 4  ;;  %s3557_s4 = smov [#allocation10]   ;;  %s80_s13 = int_to_ptr.vmem [resolvable:$true] %s79_s13 }
  0x12   :  { %85 = dma.hbm_to_vmem [thread:$0]  %s78_s30, 4096, %s80_s13, [#allocation8], %s3553_s5, %s3553_s5, %s3554_s26  }
  0x13   :  { %s93_s14 = sshll.u32 %s3557_s4, 4  ;;  %s94_s14 = int_to_ptr.vmem [resolvable:$true] %s93_s14 }
  0x14   :  { %96 = dma.hbm_to_vmem [thread:$0]  %s92_s11, 512, %s94_s14, [#allocation11]  }
  0x15   :  { %3538 = dma.done.wait [#allocation3], 512  }
  0x16   :  { %3539 = vsyncadd [#allocation3], 4294966784 }
  0x17   :  { %3540 = dma.done.wait [#allocation5], 10240  }
  0x18   :  { %3541 = vsyncadd [#allocation5], 4294957056 }
  0x19   :  { %3542 = dma.done.wait [#allocation8], 20480  }
  0x1a   :  { %3543 = vsyncadd [#allocation8], 4294946816 }
  0x1b   :  { %3544 = dma.done.wait [#allocation11], 512  }
  0x1c   :  { %3545 = vsyncadd [#allocation11], 4294966784  ;;  %v3135_v0 = vld [vmem:[%s3689_s1] sm:$0xff]  ;;  %v3139_v1 = vld [vmem:[#allocation2 + $0x18] sm:$0xff]  ;;  %vm136_vm0 = vcmask 130048   ;;  %vm189_vm1 = vcmask 523264  }
  0x1d   :  { %147 = vmatpush.bf16.msra.mxu0 %v3135_v0  ;;  %v126_v2 = vld [vmem:[%s3688_s0] sm:$0xf]  ;;  %197 = vmatpush.bf16.msra.mxu1 %v3139_v1  ;;  %v3138_v3 = vld [vmem:[#allocation2 + $0x10] sm:$0xff]  ;;  %v3137_v4 = vld [vmem:[#allocation2 + $0x8] sm:$0xff] }
  0x1e   :  { %v3136_v5 = vld [vmem:[#allocation2] sm:$0xff]  ;;  %v2233_v6 = vld [vmem:[#allocation4 + $0x70] sm:$0xf]  ;;  %v3155_v7 = vld [vmem:[#allocation4 + $0x74] sm:$0xf0] }
  0x1f   :  { %v3154_v8 = vld [vmem:[#allocation4 + $0x74] sm:$0xf]  ;;  %v2234_v9 = vor.u32 %v3155_v7, %v2233_v6  ;;  %v2235_v10 = vld [vmem:[#allocation4 + $0x78] sm:$0xf0]  ;;  %v2225_v11 = vld [vmem:[#allocation4 + $0x60] sm:$0xf] }
  0x20   :  { %2157 = vmatmul.msk.bf16.vlgmr.msra.gmra.mxu0 %vm136_vm0, %v126_v2  ;;  %v3153_v12 = vld [vmem:[#allocation4 + $0x64] sm:$0xf0]  ;;  %v2238_v13 = vor.u32 %v3154_v8, %v2235_v10  ;;  %v3152_v14 = vld [vmem:[#allocation4 + $0x64] sm:$0xf]  ;;  %v2227_v15 = vld [vmem:[#allocation4 + $0x68] sm:$0xf0] }
  0x21   :  { %198 = vmatpush.bf16.msra.mxu1 %v3138_v3  ;;  %307 = vmatpush.bf16.msra.mxu2 %v2234_v9  ;;  %v2226_v16 = vor.u32 %v3153_v12, %v2225_v11  ;;  %v2230_v17 = vor.u32 %v3152_v14, %v2227_v15  ;;  %v2217_v18 = vld [vmem:[#allocation4 + $0x50] sm:$0xf]  ;;  %v3151_v19 = vld [vmem:[#allocation4 + $0x54] sm:$0xf0]  ;;  %v3150_v20 = vld [vmem:[#allocation4 + $0x54] sm:$0xf] }
  0x22   :  { %320 = vmatpush.bf16.msra.mxu3 %v2238_v13  ;;  %v2219_v21 = vld [vmem:[#allocation4 + $0x58] sm:$0xf0]  ;;  %v2218_v22 = vor.u32 %v3151_v19, %v2217_v18  ;;  %v2209_v24 = vld [vmem:[#allocation4 + $0x40] sm:$0xf]  ;;  %v3149_v25 = vld [vmem:[#allocation4 + $0x44] sm:$0xf0] }
  0x23   :  { %v2222_v23 = vor.u32 %v3150_v20, %v2219_v21  ;;  %v3148_v26 = vld [vmem:[#allocation4 + $0x44] sm:$0xf]  ;;  %v2211_v27 = vld [vmem:[#allocation4 + $0x48] sm:$0xf0]  ;;  %v2210_v28 = vor.u32 %v3149_v25, %v2209_v24  ;;  %v2201_v30 = vld [vmem:[#allocation4 + $0x30] sm:$0xf] }
  0x24   :  { %v2214_v29 = vor.u32 %v3148_v26, %v2211_v27  ;;  %v3147_v31 = vld [vmem:[#allocation4 + $0x34] sm:$0xf0]  ;;  %v3146_v32 = vld [vmem:[#allocation4 + $0x34] sm:$0xf]  ;;  %v2203_v33 = vld [vmem:[#allocation4 + $0x38] sm:$0xf0] }
  0x25   :  { %199 = vmatpush.bf16.msra.mxu1 %v3137_v4  ;;  %308 = vmatpush.bf16.msra.mxu2 %v2226_v16  ;;  %v2202_v34 = vor.u32 %v3147_v31, %v2201_v30  ;;  %v2206_v35 = vor.u32 %v3146_v32, %v2203_v33  ;;  %v2193_v36 = vld [vmem:[#allocation4 + $0x20] sm:$0xf]  ;;  %v3145_v37 = vld [vmem:[#allocation4 + $0x24] sm:$0xf0]  ;;  %v3144_v39 = vld [vmem:[#allocation4 + $0x24] sm:$0xf] }
  0x26   :  { %321 = vmatpush.bf16.msra.mxu3 %v2230_v17  ;;  %v3627_v38 = vld [vmem:[#allocation10] sm:$0xff]  ;;  %v2195_v40 = vld [vmem:[#allocation4 + $0x28] sm:$0xf0]  ;;  %v2194_v41 = vor.u32 %v3145_v37, %v2193_v36  ;;  %v2185_v50 = vld [vmem:[#allocation4 + $0x10] sm:$0xf] }
  0x27   :  { %v129_v42 = vperm.slane %v3627_v38, 0  ;;  %v2198_v43 = vor.u32 %v3144_v39, %v2195_v40  ;;  %v3143_v51 = vld [vmem:[#allocation4 + $0x14] sm:$0xf0]  ;;  %v3142_v52 = vld [vmem:[#allocation4 + $0x14] sm:$0xf] }
  0x28   :  { %v2186_v53 = vor.u32 %v3143_v51, %v2185_v50  ;;  %v2187_v54 = vld [vmem:[#allocation4 + $0x18] sm:$0xf0]  ;;  %v2177_v56 = vld [vmem:[#allocation4] sm:$0xf]  ;;  %v3141_v57 = vld [vmem:[#allocation4 + $0x4] sm:$0xf0] }
  0x29   :  { %200 = vmatpush.bf16.msra.mxu1 %v3136_v5  ;;  %309 = vmatpush.bf16.msra.mxu2 %v2218_v22  ;;  %v2190_v55 = vor.u32 %v3142_v52, %v2187_v54  ;;  %v3140_v58 = vld [vmem:[#allocation4 + $0x4] sm:$0xf]  ;;  %v2178_v59 = vor.u32 %v3141_v57, %v2177_v56  ;;  %v2179_v60 = vld [vmem:[#allocation4 + $0x8] sm:$0xf0]  ;;  %v2353_v62 = vld [vmem:[#allocation6 + $0xe0] sm:$0xf] }
  0x2a   :  { %322 = vmatpush.bf16.msra.mxu3 %v2222_v23  ;;  %v2182_v61 = vor.u32 %v3140_v58, %v2179_v60  ;;  %v3186_v63 = vld [vmem:[#allocation6 + $0xec] sm:$0xf0]  ;;  %v2481_v0 = vld [vmem:[#allocation6 + $0x1e0] sm:$0xf]  ;;  %v3184_v3 = vld [vmem:[#allocation6 + $0xe4] sm:$0xf] }
  0x2b   :  { %v2354_v1 = vor.u32 %v3186_v63, %v2353_v62  ;;  %v3218_v2 = vld [vmem:[#allocation6 + $0x1ec] sm:$0xf0]  ;;  %v2355_v4 = vld [vmem:[#allocation6 + $0xf0] sm:$0xf0]  ;;  %v3216_v7 = vld [vmem:[#allocation6 + $0x1e4] sm:$0xf] }
  0x2c   :  { %v2482_v5 = vor.u32 %v3218_v2, %v2481_v0  ;;  %v2358_v6 = vor.u32 %v3184_v3, %v2355_v4  ;;  %v2483_v8 = vld [vmem:[#allocation6 + $0x1f0] sm:$0xf0]  ;;  %v2337_v9 = vld [vmem:[#allocation6 + $0xc0] sm:$0xf]  ;;  %v3182_v11 = vld [vmem:[#allocation6 + $0xcc] sm:$0xf0] }
  0x2d   :  { %310 = vmatpush.bf16.msra.mxu2 %v2210_v28  ;;  %727 = vmatpush.bf16.msrb.mxu0 %v2354_v1  ;;  %v2486_v10 = vor.u32 %v3216_v7, %v2483_v8  ;;  %v2465_v12 = vld [vmem:[#allocation6 + $0x1c0] sm:$0xf]  ;;  %v3214_v13 = vld [vmem:[#allocation6 + $0x1cc] sm:$0xf0]  ;;  %v2338_v14 = vor.u32 %v3182_v11, %v2337_v9  ;;  %v3180_v16 = vld [vmem:[#allocation6 + $0xc4] sm:$0xf] }
  0x2e   :  { %323 = vmatpush.bf16.msra.mxu3 %v2214_v29  ;;  %740 = vmatpush.bf16.msrb.mxu1 %v2482_v5  ;;  %v2466_v15 = vor.u32 %v3214_v13, %v2465_v12  ;;  %v2339_v17 = vld [vmem:[#allocation6 + $0xd0] sm:$0xf0]  ;;  %v3212_v18 = vld [vmem:[#allocation6 + $0x1c4] sm:$0xf]  ;;  %v2321_v21 = vld [vmem:[#allocation6 + $0xa0] sm:$0xf] }
  0x2f   :  { %v2342_v19 = vor.u32 %v3180_v16, %v2339_v17  ;;  %v2467_v20 = vld [vmem:[#allocation6 + $0x1d0] sm:$0xf0]  ;;  %v3178_v22 = vld [vmem:[#allocation6 + $0xac] sm:$0xf0]  ;;  %v2449_v24 = vld [vmem:[#allocation6 + $0x1a0] sm:$0xf] }
  0x30   :  { %v2470_v23 = vor.u32 %v3212_v18, %v2467_v20  ;;  %v3210_v25 = vld [vmem:[#allocation6 + $0x1ac] sm:$0xf0]  ;;  %v3176_v26 = vld [vmem:[#allocation6 + $0xa4] sm:$0xf]  ;;  %v2322_v27 = vor.u32 %v3178_v22, %v2321_v21  ;;  %v2323_v28 = vld [vmem:[#allocation6 + $0xb0] sm:$0xf0] }
  0x31   :  { %311 = vmatpush.bf16.msra.mxu2 %v2202_v34  ;;  %728 = vmatpush.bf16.msrb.mxu0 %v2338_v14  ;;  %v3208_v29 = vld [vmem:[#allocation6 + $0x1a4] sm:$0xf]  ;;  %v2451_v30 = vld [vmem:[#allocation6 + $0x1b0] sm:$0xf0]  ;;  %v2450_v31 = vor.u32 %v3210_v25, %v2449_v24  ;;  %v2326_v32 = vor.u32 %v3176_v26, %v2323_v28  ;;  %v2305_v33 = vld [vmem:[#allocation6 + $0x80] sm:$0xf] }
  0x32   :  { %324 = vmatpush.bf16.msra.mxu3 %v2206_v35  ;;  %741 = vmatpush.bf16.msrb.mxu1 %v2466_v15  ;;  %v3174_v34 = vld [vmem:[#allocation6 + $0x8c] sm:$0xf0]  ;;  %v2433_v35 = vld [vmem:[#allocation6 + $0x180] sm:$0xf]  ;;  %v2454_v36 = vor.u32 %v3208_v29, %v2451_v30  ;;  %v3172_v39 = vld [vmem:[#allocation6 + $0x84] sm:$0xf] }
  0x33   :  { %v3206_v37 = vld [vmem:[#allocation6 + $0x18c] sm:$0xf0]  ;;  %v2307_v40 = vld [vmem:[#allocation6 + $0x90] sm:$0xf0]  ;;  %v3168_v51 = vld [vmem:[#allocation6 + $0x64] sm:$0xf] }
  0x34   :  { %v3202_v50 = vld [vmem:[#allocation6 + $0x16c] sm:$0xf0]  ;;  %v2291_v52 = vld [vmem:[#allocation6 + $0x70] sm:$0xf0]  ;;  %v2273_v58 = vld [vmem:[#allocation6 + $0x40] sm:$0xf] }
  0x35   :  { %312 = vmatpush.bf16.msra.mxu2 %v2194_v41  ;;  %v3204_v41 = vld [vmem:[#allocation6 + $0x184] sm:$0xf]  ;;  %729 = vmatpush.bf16.msrb.mxu0 %v2322_v27  ;;  %v2419_v54 = vld [vmem:[#allocation6 + $0x170] sm:$0xf0]  ;;  %v2294_v57 = vor.u32 %v3168_v51, %v2291_v52  ;;  %v2401_v60 = vld [vmem:[#allocation6 + $0x140] sm:$0xf] }
  0x36   :  { %325 = vmatpush.bf16.msra.mxu3 %v2198_v43  ;;  %v2306_v43 = vor.u32 %v3174_v34, %v2305_v33  ;;  %742 = vmatpush.bf16.msrb.mxu1 %v2450_v31  ;;  %v3198_v62 = vld [vmem:[#allocation6 + $0x14c] sm:$0xf0]  ;;  %v3164_v63 = vld [vmem:[#allocation6 + $0x44] sm:$0xf]  ;;  %v2275_v0 = vld [vmem:[#allocation6 + $0x50] sm:$0xf0] }
  0x37   :  { %v3196_v1 = vld [vmem:[#allocation6 + $0x144] sm:$0xf]  ;;  %v2403_v2 = vld [vmem:[#allocation6 + $0x150] sm:$0xf0]  ;;  %v164_v3 = vperm.slane %v3627_v38, 1  ;;  %v2402_v5 = vor.u32 %v3198_v62, %v2401_v60 }
  0x38   :  { %v2257_v7 = vld [vmem:[#allocation6 + $0x20] sm:$0xf]  ;;  %v3162_v8 = vld [vmem:[#allocation6 + $0x2c] sm:$0xf0]  ;;  %v3160_v12 = vld [vmem:[#allocation6 + $0x24] sm:$0xf] }
  0x39   :  { %313 = vmatpush.bf16.msra.mxu2 %v2186_v53  ;;  %v3200_v53 = vld [vmem:[#allocation6 + $0x164] sm:$0xf]  ;;  %730 = vmatpush.bf16.msrb.mxu0 %v2306_v43  ;;  %v2385_v9 = vld [vmem:[#allocation6 + $0x120] sm:$0xf]  ;;  %v3194_v11 = vld [vmem:[#allocation6 + $0x12c] sm:$0xf0]  ;;  %v2258_v17 = vor.u32 %v3162_v8, %v2257_v7 }
  0x3a   :  { %326 = vmatpush.bf16.msra.mxu3 %v2190_v55  ;;  %v2259_v13 = vld [vmem:[#allocation6 + $0x30] sm:$0xf0]  ;;  %v3192_v14 = vld [vmem:[#allocation6 + $0x124] sm:$0xf]  ;;  %v2241_v18 = vld [vmem:[#allocation6] sm:$0xf]  ;;  %v2386_v20 = vor.u32 %v3194_v11, %v2385_v9 }
  0x3b   :  { %v2387_v15 = vld [vmem:[#allocation6 + $0x130] sm:$0xf0]  ;;  %v2262_v21 = vor.u32 %v3160_v12, %v2259_v13  ;;  %v3158_v22 = vld [vmem:[#allocation6 + $0xc] sm:$0xf0]  ;;  %v3156_v26 = vld [vmem:[#allocation6 + $0x4] sm:$0xf] }
  0x3c   :  { %v3190_v24 = vld [vmem:[#allocation6 + $0x10c] sm:$0xf0]  ;;  %v2390_v25 = vor.u32 %v3192_v14, %v2387_v15  ;;  %v2243_v27 = vld [vmem:[#allocation6 + $0x10] sm:$0xf0]  ;;  %v3188_v28 = vld [vmem:[#allocation6 + $0x104] sm:$0xf] }
  0x3d   :  { %314 = vmatpush.bf16.msra.mxu2 %v2178_v59  ;;  %v3166_v59 = vld [vmem:[#allocation6 + $0x4c] sm:$0xf0]  ;;  %v2371_v30 = vld [vmem:[#allocation6 + $0x110] sm:$0xf0]  ;;  %v2361_v31 = vld [vmem:[#allocation6 + $0xe8] sm:$0xf] }
  0x3e   :  { %327 = vmatpush.bf16.msra.mxu3 %v2182_v61  ;;  %v2422_v61 = vor.u32 %v3200_v53, %v2419_v54  ;;  %v2274_v4 = vor.u32 %v3166_v59, %v2273_v58  ;;  %v3187_v33 = vld [vmem:[#allocation6 + $0xf4] sm:$0xf0]  ;;  %v2489_v34 = vld [vmem:[#allocation6 + $0x1e8] sm:$0xf]  ;;  %v2491_v43 = vld [vmem:[#allocation6 + $0x1f8] sm:$0xf0] }
  0x3f   :  { %v3183_v51 = vld [vmem:[#allocation6 + $0xd4] sm:$0xf0]  ;;  %v2473_v52 = vld [vmem:[#allocation6 + $0x1c8] sm:$0xf]  ;;  %v2475_v58 = vld [vmem:[#allocation6 + $0x1d8] sm:$0xf0] }
  0x40   :  { %v3215_v54 = vld [vmem:[#allocation6 + $0x1d4] sm:$0xf0]  ;;  %v3209_v7 = vld [vmem:[#allocation6 + $0x1ac] sm:$0xf]  ;;  %v2459_v8 = vld [vmem:[#allocation6 + $0x1b8] sm:$0xf0] }
  0x41   :  { %753 = vmatpush.bf16.msrb.mxu2 %v2358_v6  ;;  %v2278_v6 = vor.u32 %v3164_v63, %v2275_v0  ;;  %v2474_v60 = vor.u32 %v3215_v54, %v2473_v52  ;;  %v2329_v63 = vld [vmem:[#allocation6 + $0xa8] sm:$0xf]  ;;  %v3179_v0 = vld [vmem:[#allocation6 + $0xb4] sm:$0xf0]  ;;  %v3161_v52 = vld [vmem:[#allocation6 + $0x2c] sm:$0xf] }
  0x42   :  { %766 = vmatpush.bf16.msrb.mxu3 %v2486_v10  ;;  %v2406_v10 = vor.u32 %v3196_v1, %v2403_v2  ;;  %v2330_v1 = vor.u32 %v3179_v0, %v2329_v63  ;;  %v2457_v2 = vld [vmem:[#allocation6 + $0x1a8] sm:$0xf]  ;;  %v3175_v12 = vld [vmem:[#allocation6 + $0x94] sm:$0xf0]  ;;  %v2267_v54 = vld [vmem:[#allocation6 + $0x38] sm:$0xf0] }
  0x43   :  { %v2313_v11 = vld [vmem:[#allocation6 + $0x88] sm:$0xf]  ;;  %v3207_v15 = vld [vmem:[#allocation6 + $0x194] sm:$0xf0]  ;;  %v3157_v0 = vld [vmem:[#allocation6 + $0xc] sm:$0xf] }
  0x44   :  { %v2441_v13 = vld [vmem:[#allocation6 + $0x188] sm:$0xf]  ;;  %v2314_v14 = vor.u32 %v3175_v12, %v2313_v11  ;;  %v3191_v63 = vld [vmem:[#allocation6 + $0x114] sm:$0xf0] }
  0x45   :  { %754 = vmatpush.bf16.msrb.mxu2 %v2342_v19 }
  0x46   :  { %767 = vmatpush.bf16.msrb.mxu3 %v2470_v23  ;;  %v2369_v23 = vld [vmem:[#allocation6 + $0x100] sm:$0xf] }
  0x49   :  { %755 = vmatpush.bf16.msrb.mxu2 %v2326_v32  ;;  %v2242_v32 = vor.u32 %v3158_v22, %v2241_v18  ;;  %v2442_v18 = vor.u32 %v3207_v15, %v2441_v13  ;;  %v2609_v15 = vld [vmem:[#allocation7 + $0xe0] sm:$0xf] }
  0x4a   :  { %768 = vmatpush.bf16.msrb.mxu3 %v2454_v36 }
  0x9d   :  { %v149_v44 = vpop.f32.mrf.mxu0 }
  0x9e   :  { %v150_v45 = vadd.f32 %v149_v44, %v129_v42  ;;  %v2435_v42 = vld [vmem:[#allocation6 + $0x190] sm:$0xf0]  ;;  %v2434_v44 = vor.u32 %v3206_v37, %v2433_v35  ;;  %v3219_v35 = vld [vmem:[#allocation6 + $0x1f4] sm:$0xf0]  ;;  %v3185_v37 = vld [vmem:[#allocation6 + $0xec] sm:$0xf] }
  0xa0   :  { %v153_v46 = vmax.f32 %v150_v45, 0.0  ;;  %v2310_v45 = vor.u32 %v3172_v39, %v2307_v40  ;;  %743 = vmatpush.bf16.msrb.mxu1 %v2434_v44  ;;  %v2363_v39 = vld [vmem:[#allocation6 + $0xf8] sm:$0xf0]  ;;  %v2370_v40 = vor.u32 %v3190_v24, %v2369_v23  ;;  %v2297_v23 = vld [vmem:[#allocation6 + $0x68] sm:$0xf] }
  0xa1   :  { %v3171_v24 = vld [vmem:[#allocation6 + $0x74] sm:$0xf0] }
  0xa2   :  { %v154_v47 = vmin.f32 %v153_v46, 6.0  ;;  %v2289_v46 = vld [vmem:[#allocation6 + $0x60] sm:$0xf]  ;;  %756 = vmatpush.bf16.msrb.mxu2 %v2310_v45  ;;  %v2374_v45 = vor.u32 %v3188_v28, %v2371_v30  ;;  %v3169_v28 = vld [vmem:[#allocation6 + $0x6c] sm:$0xf] }
  0xa4   :  { %v155_v48 = vpack.c.bf16 %v154_v47, %v154_v47  ;;  %v3170_v47 = vld [vmem:[#allocation6 + $0x6c] sm:$0xf0] }
  0xa5   :  { %v151_v49 = vpop.f32.mrf.mxu0  ;;  %v2290_v55 = vor.u32 %v3170_v47, %v2289_v46  ;;  %v2362_v46 = vor.u32 %v3187_v33, %v2361_v31  ;;  %v2427_v33 = vld [vmem:[#allocation6 + $0x178] sm:$0xf0] }
  0xa6   :  { %2174 = vmatmul.msk.bf16.vlgmr.msra.gmra.mxu1 %vm189_vm1, %v155_v48  ;;  %v2417_v48 = vld [vmem:[#allocation6 + $0x160] sm:$0xf]  ;;  %v2438_v49 = vor.u32 %v3204_v41, %v2435_v42  ;;  %757 = vmatpush.bf16.msrb.mxu2 %v2294_v57  ;;  %v2246_v41 = vor.u32 %v3156_v26, %v2243_v27  ;;  %v3217_v42 = vld [vmem:[#allocation6 + $0x1ec] sm:$0xf]  ;;  %v2298_v26 = vor.u32 %v3171_v24, %v2297_v23  ;;  %v3203_v27 = vld [vmem:[#allocation6 + $0x174] sm:$0xf0] }
  0xa7   :  { %v2418_v56 = vor.u32 %v3202_v50, %v2417_v48  ;;  %731 = vmatpush.bf16.msrb.mxu0 %v2290_v55  ;;  %v2490_v48 = vor.u32 %v3219_v35, %v2489_v34  ;;  %v2345_v50 = vld [vmem:[#allocation6 + $0xc8] sm:$0xf]  ;;  %v2494_v53 = vor.u32 %v3217_v42, %v2491_v43  ;;  %v3181_v55 = vld [vmem:[#allocation6 + $0xcc] sm:$0xf]  ;;  %v2283_v43 = vld [vmem:[#allocation6 + $0x58] sm:$0xf0] }
  0xa8   :  { %769 = vmatpush.bf16.msrb.mxu3 %v2438_v49  ;;  %v2366_v49 = vor.u32 %v3185_v37, %v2363_v39  ;;  %v3213_v57 = vld [vmem:[#allocation6 + $0x1cc] sm:$0xf]  ;;  %v2346_v59 = vor.u32 %v3183_v51, %v2345_v50  ;;  %v2281_v34 = vld [vmem:[#allocation6 + $0x48] sm:$0xf]  ;;  %v3199_v39 = vld [vmem:[#allocation6 + $0x154] sm:$0xf0] }
  0xa9   :  { %744 = vmatpush.bf16.msrb.mxu1 %v2418_v56  ;;  %v2347_v56 = vld [vmem:[#allocation6 + $0xd8] sm:$0xf0]  ;;  %v2478_v62 = vor.u32 %v3213_v57, %v2475_v58  ;;  %v2409_v37 = vld [vmem:[#allocation6 + $0x148] sm:$0xf]  ;;  %v3165_v42 = vld [vmem:[#allocation6 + $0x4c] sm:$0xf]  ;;  %v2270_v58 = vor.u32 %v3161_v52, %v2267_v54 }
  0xaa   :  { %758 = vmatpush.bf16.msrb.mxu2 %v2278_v6  ;;  %v2331_v6 = vld [vmem:[#allocation6 + $0xb8] sm:$0xf0]  ;;  %v2393_v50 = vld [vmem:[#allocation6 + $0x128] sm:$0xf]  ;;  %v3195_v51 = vld [vmem:[#allocation6 + $0x134] sm:$0xf0] }
  0xab   :  { %732 = vmatpush.bf16.msrb.mxu0 %v2274_v4  ;;  %v3177_v4 = vld [vmem:[#allocation6 + $0xac] sm:$0xf]  ;;  %v2394_v57 = vor.u32 %v3195_v51, %v2393_v50  ;;  %v2833_v50 = vld [vmem:[#allocation7 + $0x2a0] sm:$0xf]  ;;  %v3306_v52 = vld [vmem:[#allocation7 + $0x2ac] sm:$0xf0] }
  0xac   :  { %770 = vmatpush.bf16.msrb.mxu3 %v2422_v61  ;;  %v2350_v61 = vor.u32 %v3181_v55, %v2347_v56  ;;  %v2334_v9 = vor.u32 %v3177_v4, %v2331_v6  ;;  %v3193_v55 = vld [vmem:[#allocation6 + $0x12c] sm:$0xf]  ;;  %v2395_v56 = vld [vmem:[#allocation6 + $0x138] sm:$0xf0]  ;;  %v3338_v54 = vld [vmem:[#allocation7 + $0x3ac] sm:$0xf0] }
  0xad   :  { %745 = vmatpush.bf16.msrb.mxu1 %v2402_v5 }
  0xae   :  { %759 = vmatpush.bf16.msrb.mxu2 %v2262_v21  ;;  %v2443_v21 = vld [vmem:[#allocation6 + $0x198] sm:$0xf0] }
  0xaf   :  { %733 = vmatpush.bf16.msrb.mxu0 %v2258_v17  ;;  %v2315_v17 = vld [vmem:[#allocation6 + $0x98] sm:$0xf0] }
  0xb0   :  { %771 = vmatpush.bf16.msrb.mxu3 %v2406_v10  ;;  %v2462_v10 = vor.u32 %v3209_v7, %v2459_v8  ;;  %v3631_v8 = vld [vmem:[#allocation10 + $0x8] sm:$0xff] }
  0xb1   :  { %746 = vmatpush.bf16.msrb.mxu1 %v2386_v20  ;;  %v3205_v20 = vld [vmem:[#allocation6 + $0x18c] sm:$0xf] }
  0xb2   :  { %760 = vmatpush.bf16.msrb.mxu2 %v2246_v41  ;;  %v2446_v22 = vor.u32 %v3205_v20, %v2443_v21  ;;  %v2410_v41 = vor.u32 %v3199_v39, %v2409_v37  ;;  %v3282_v20 = vld [vmem:[#allocation7 + $0x1ec] sm:$0xf0]  ;;  %v2865_v21 = vld [vmem:[#allocation7 + $0x2e0] sm:$0xf] }
  0xb3   :  { %734 = vmatpush.bf16.msrb.mxu0 %v2242_v32  ;;  %v3201_v32 = vld [vmem:[#allocation6 + $0x16c] sm:$0xf]  ;;  %v2849_v37 = vld [vmem:[#allocation7 + $0x2c0] sm:$0xf] }
  0xb4   :  { %772 = vmatpush.bf16.msrb.mxu3 %v2390_v25  ;;  %v2425_v25 = vld [vmem:[#allocation6 + $0x168] sm:$0xf]  ;;  %v2430_v35 = vor.u32 %v3201_v32, %v2427_v33 }
  0xb5   :  { %747 = vmatpush.bf16.msrb.mxu1 %v2370_v40  ;;  %v2426_v30 = vor.u32 %v3203_v27, %v2425_v25  ;;  %v2993_v25 = vld [vmem:[#allocation7 + $0x3e0] sm:$0xf] }
  0xb7   :  { %779 = vmatpush.bf16.msra.mxu0 %v2362_v46  ;;  %v2411_v46 = vld [vmem:[#allocation6 + $0x158] sm:$0xf0] }
  0xb8   :  { %773 = vmatpush.bf16.msrb.mxu3 %v2374_v45  ;;  %v2286_v45 = vor.u32 %v3165_v42, %v2283_v43  ;;  %v3342_v42 = vld [vmem:[#allocation7 + $0x3cc] sm:$0xf0] }
  0xb9   :  { %792 = vmatpush.bf16.msra.mxu1 %v2490_v48  ;;  %v3163_v48 = vld [vmem:[#allocation6 + $0x34] sm:$0xf0] }
  0xbb   :  { %780 = vmatpush.bf16.msra.mxu0 %v2346_v59  ;;  %v2249_v59 = vld [vmem:[#allocation6 + $0x8] sm:$0xf] }
  0xbd   :  { %793 = vmatpush.bf16.msra.mxu1 %v2474_v60  ;;  %v3159_v60 = vld [vmem:[#allocation6 + $0x14] sm:$0xf0] }
  0xbe   :  { %v2250_v4 = vor.u32 %v3159_v60, %v2249_v59  ;;  %v2689_v59 = vld [vmem:[#allocation7 + $0x180] sm:$0xf]  ;;  %v3270_v60 = vld [vmem:[#allocation7 + $0x18c] sm:$0xf0] }
  0xbf   :  { %781 = vmatpush.bf16.msra.mxu0 %v2330_v1  ;;  %v2251_v1 = vld [vmem:[#allocation6 + $0x18] sm:$0xf0] }
  0xc0   :  { %v2254_v6 = vor.u32 %v3157_v0, %v2251_v1  ;;  %v3302_v0 = vld [vmem:[#allocation7 + $0x28c] sm:$0xf0]  ;;  %v2945_v1 = vld [vmem:[#allocation7 + $0x380] sm:$0xf] }
  0xc3   :  { %782 = vmatpush.bf16.msra.mxu0 %v2314_v14 }
  0xc7   :  { %783 = vmatpush.bf16.msra.mxu0 %v2298_v26  ;;  %v3346_v26 = vld [vmem:[#allocation7 + $0x3ec] sm:$0xf0] }
  0xc8   :  { %v2994_v39 = vor.u32 %v3346_v26, %v2993_v25  ;;  %v3294_v25 = vld [vmem:[#allocation7 + $0x24c] sm:$0xf0]  ;;  %v2913_v26 = vld [vmem:[#allocation7 + $0x340] sm:$0xf] }
 0x123   :  { %v202_v16 = vpop.f32.mrf.mxu1 }
 0x124   :  { %v203_v19 = vadd.f32 %v202_v16, %v164_v3  ;;  %v3211_v3 = vld [vmem:[#allocation6 + $0x1b4] sm:$0xf0]  ;;  %v3173_v16 = vld [vmem:[#allocation6 + $0x8c] sm:$0xf] }
 0x125   :  { %v2458_v5 = vor.u32 %v3211_v3, %v2457_v2  ;;  %v3189_v2 = vld [vmem:[#allocation6 + $0x10c] sm:$0xf]  ;;  %v2379_v3 = vld [vmem:[#allocation6 + $0x118] sm:$0xf0] }
 0x126   :  { %v206_v29 = vmax.f32 %v203_v19, 0.0  ;;  %v2318_v19 = vor.u32 %v3173_v16, %v2315_v17  ;;  %v2382_v7 = vor.u32 %v3189_v2, %v2379_v3  ;;  %v3334_v2 = vld [vmem:[#allocation7 + $0x38c] sm:$0xf0] }
 0x127   :  { %794 = vmatpush.bf16.msra.mxu1 %v2458_v5 }
 0x128   :  { %v207_v36 = vmin.f32 %v206_v29, 6.0  ;;  %v2299_v29 = vld [vmem:[#allocation6 + $0x78] sm:$0xf0] }
 0x129   :  { %v2302_v31 = vor.u32 %v3169_v28, %v2299_v29  ;;  %v2593_v29 = vld [vmem:[#allocation7 + $0xc0] sm:$0xf] }
 0x12a   :  { %v208_v44 = vpack.c.bf16 %v207_v36, %v207_v36  ;;  %v3167_v36 = vld [vmem:[#allocation6 + $0x54] sm:$0xf0] }
 0x12b   :  { %v204_v47 = vpop.f32.mrf.mxu1  ;;  %795 = vmatpush.bf16.msra.mxu1 %v2442_v18  ;;  %v2282_v40 = vor.u32 %v3167_v36, %v2281_v34  ;;  %v3250_v18 = vld [vmem:[#allocation7 + $0xec] sm:$0xf0]  ;;  %v2721_v34 = vld [vmem:[#allocation7 + $0x1c0] sm:$0xf] }
 0x12c   :  { %315 = vmatmul.bf16.vlgmr.msra.gmra.mxu2 %v208_v44  ;;  %328 = vmatmul.bf16.vlgmr.msra.gmra.mxu3 %v208_v44  ;;  %v3197_v44 = vld [vmem:[#allocation6 + $0x14c] sm:$0xf]  ;;  %v2265_v47 = vld [vmem:[#allocation6 + $0x28] sm:$0xf]  ;;  %v2610_v28 = vor.u32 %v3250_v18, %v2609_v15  ;;  %v3330_v15 = vld [vmem:[#allocation7 + $0x36c] sm:$0xf0] }
 0x12d   :  { %805 = vmatpush.bf16.msra.mxu2 %v2366_v49  ;;  %818 = vmatpush.bf16.msra.mxu3 %v2494_v53  ;;  %v2414_v49 = vor.u32 %v3197_v44, %v2411_v46  ;;  %v2266_v53 = vor.u32 %v3163_v48, %v2265_v47  ;;  %v2577_v44 = vld [vmem:[#allocation7 + $0xa0] sm:$0xf]  ;;  %v3274_v48 = vld [vmem:[#allocation7 + $0x1ac] sm:$0xf0] }
 0x12e   :  { %784 = vmatpush.bf16.msra.mxu0 %v2282_v40  ;;  %v3310_v40 = vld [vmem:[#allocation7 + $0x2cc] sm:$0xf0]  ;;  %v2705_v47 = vld [vmem:[#allocation7 + $0x1a0] sm:$0xf] }
 0x12f   :  { %796 = vmatpush.bf16.msra.mxu1 %v2426_v30  ;;  %v3246_v30 = vld [vmem:[#allocation7 + $0xcc] sm:$0xf0] }
 0x130   :  { %v2594_v43 = vor.u32 %v3246_v30, %v2593_v29  ;;  %v3230_v18 = vld [vmem:[#allocation7 + $0x4c] sm:$0xf0]  ;;  %v2513_v30 = vld [vmem:[#allocation7 + $0x20] sm:$0xf] }
 0x131   :  { %806 = vmatpush.bf16.msra.mxu2 %v2350_v61  ;;  %819 = vmatpush.bf16.msra.mxu3 %v2478_v62  ;;  %v2377_v61 = vld [vmem:[#allocation6 + $0x108] sm:$0xf]  ;;  %v2398_v62 = vor.u32 %v3193_v55, %v2395_v56  ;;  %v2561_v56 = vld [vmem:[#allocation7 + $0x80] sm:$0xf] }
 0x132   :  { %785 = vmatpush.bf16.msra.mxu0 %v2266_v53  ;;  %v2378_v5 = vor.u32 %v3191_v63, %v2377_v61  ;;  %v2961_v53 = vld [vmem:[#allocation7 + $0x3a0] sm:$0xf]  ;;  %v2834_v61 = vor.u32 %v3306_v52, %v2833_v50  ;;  %v3280_v50 = vld [vmem:[#allocation7 + $0x1e4] sm:$0xf] }
 0x133   :  { %797 = vmatpush.bf16.msra.mxu1 %v2410_v41  ;;  %v2977_v41 = vld [vmem:[#allocation7 + $0x3c0] sm:$0xf]  ;;  %v2962_v63 = vor.u32 %v3338_v54, %v2961_v53  ;;  %v3286_v53 = vld [vmem:[#allocation7 + $0x20c] sm:$0xf0] }
 0x134   :  { %v2978_v51 = vor.u32 %v3342_v42, %v2977_v41  ;;  %v3322_v41 = vld [vmem:[#allocation7 + $0x32c] sm:$0xf0]  ;;  %v2753_v52 = vld [vmem:[#allocation7 + $0x200] sm:$0xf] }
 0x135   :  { %807 = vmatpush.bf16.msra.mxu2 %v2334_v9  ;;  %820 = vmatpush.bf16.msra.mxu3 %v2462_v10  ;;  %v225_v9 = vperm.slane %v3627_v38, 2  ;;  %v226_v10 = vperm.slane %v3631_v8, 2  ;;  %v3222_v42 = vld [vmem:[#allocation7 + $0xc] sm:$0xf0] }
 0x136   :  { %786 = vmatpush.bf16.msra.mxu0 %v2250_v4  ;;  %v2545_v4 = vld [vmem:[#allocation7 + $0x60] sm:$0xf] }
 0x137   :  { %798 = vmatpush.bf16.msra.mxu1 %v2394_v57  ;;  %v3238_v57 = vld [vmem:[#allocation7 + $0x8c] sm:$0xf0] }
 0x138   :  { %v2562_v3 = vor.u32 %v3238_v57, %v2561_v56  ;;  %v3312_v56 = vld [vmem:[#allocation7 + $0x2e4] sm:$0xf]  ;;  %v2867_v57 = vld [vmem:[#allocation7 + $0x2f0] sm:$0xf0] }
 0x139   :  { %808 = vmatpush.bf16.msra.mxu2 %v2318_v19  ;;  %821 = vmatpush.bf16.msra.mxu3 %v2446_v22  ;;  %v2737_v19 = vld [vmem:[#allocation7 + $0x1e0] sm:$0xf]  ;;  %v3314_v22 = vld [vmem:[#allocation7 + $0x2ec] sm:$0xf0] }
 0x13a   :  { %v2866_v36 = vor.u32 %v3314_v22, %v2865_v21  ;;  %v3262_v21 = vld [vmem:[#allocation7 + $0x14c] sm:$0xf0] }
 0x13b   :  { %799 = vmatpush.bf16.msra.mxu1 %v2378_v5  ;;  %v3234_v5 = vld [vmem:[#allocation7 + $0x6c] sm:$0xf0] }
 0x13d   :  { %809 = vmatpush.bf16.msra.mxu2 %v2302_v31  ;;  %822 = vmatpush.bf16.msra.mxu3 %v2430_v35  ;;  %v2738_v31 = vor.u32 %v3282_v20, %v2737_v19  ;;  %v3278_v35 = vld [vmem:[#allocation7 + $0x1cc] sm:$0xf0]  ;;  %v2657_v20 = vld [vmem:[#allocation7 + $0x140] sm:$0xf] }
 0x13e   :  { %v2722_v46 = vor.u32 %v3278_v35, %v2721_v34  ;;  %v3258_v34 = vld [vmem:[#allocation7 + $0x12c] sm:$0xf0] }
 0x141   :  { %810 = vmatpush.bf16.msra.mxu2 %v2286_v45  ;;  %823 = vmatpush.bf16.msra.mxu3 %v2414_v49  ;;  %v3242_v45 = vld [vmem:[#allocation7 + $0xac] sm:$0xf0]  ;;  %v2850_v49 = vor.u32 %v3310_v40, %v2849_v37  ;;  %v2897_v40 = vld [vmem:[#allocation7 + $0x320] sm:$0xf] }
 0x142   :  { %v2578_v55 = vor.u32 %v3242_v45, %v2577_v44  ;;  %v3248_v44 = vld [vmem:[#allocation7 + $0xe4] sm:$0xf]  ;;  %v2625_v45 = vld [vmem:[#allocation7 + $0x100] sm:$0xf] }
 0x145   :  { %811 = vmatpush.bf16.msra.mxu2 %v2270_v58  ;;  %824 = vmatpush.bf16.msra.mxu3 %v2398_v62  ;;  %v2706_v58 = vor.u32 %v3274_v48, %v2705_v47  ;;  %v2817_v62 = vld [vmem:[#allocation7 + $0x280] sm:$0xf]  ;;  %v2898_v48 = vor.u32 %v3322_v41, %v2897_v40  ;;  %v2835_v41 = vld [vmem:[#allocation7 + $0x2b0] sm:$0xf0] }
 0x149   :  { %812 = vmatpush.bf16.msra.mxu2 %v2254_v6  ;;  %825 = vmatpush.bf16.msra.mxu3 %v2382_v7  ;;  %v2690_v6 = vor.u32 %v3270_v60, %v2689_v59  ;;  %v2673_v7 = vld [vmem:[#allocation7 + $0x160] sm:$0xf]  ;;  %v3244_v59 = vld [vmem:[#allocation7 + $0xc4] sm:$0xf] }
 0x1af   :  { %v316_v11 = vpop.f32.mrf.mxu2  ;;  %v329_v12 = vpop.f32.mrf.mxu3 }
 0x1b0   :  { %v317_v13 = vadd.f32 %v316_v11, %v225_v9  ;;  %v330_v14 = vadd.f32 %v329_v12, %v226_v10  ;;  %v3266_v9 = vld [vmem:[#allocation7 + $0x16c] sm:$0xf0]  ;;  %v2818_v10 = vor.u32 %v3302_v0, %v2817_v62  ;;  %v2801_v11 = vld [vmem:[#allocation7 + $0x260] sm:$0xf]  ;;  %v2946_v12 = vor.u32 %v3334_v2, %v2945_v1  ;;  %v3276_v62 = vld [vmem:[#allocation7 + $0x1c4] sm:$0xf] }
 0x1b1   :  { %v2674_v19 = vor.u32 %v3266_v9, %v2673_v7  ;;  %v2754_v0 = vor.u32 %v3286_v53, %v2753_v52  ;;  %v2870_v1 = vor.u32 %v3312_v56, %v2867_v57  ;;  %v2707_v7 = vld [vmem:[#allocation7 + $0x1b0] sm:$0xf0]  ;;  %v3256_v53 = vld [vmem:[#allocation7 + $0x124] sm:$0xf] }
 0x1b2   :  { %v333_v16 = vmax.f32 %v317_v13, 0.0  ;;  %v334_v17 = vmax.f32 %v330_v14, 0.0  ;;  %v3298_v13 = vld [vmem:[#allocation7 + $0x26c] sm:$0xf0]  ;;  %v2929_v14 = vld [vmem:[#allocation7 + $0x360] sm:$0xf] }
 0x1b3   :  { %v2802_v22 = vor.u32 %v3298_v13, %v2801_v11  ;;  %v3236_v11 = vld [vmem:[#allocation7 + $0x84] sm:$0xf]  ;;  %v2963_v57 = vld [vmem:[#allocation7 + $0x3b0] sm:$0xf0] }
 0x1b4   :  { %v335_v23 = vmin.f32 %v333_v16, 6.0  ;;  %v336_v24 = vmin.f32 %v334_v17, 6.0  ;;  %v2546_v16 = vor.u32 %v3234_v5, %v2545_v4  ;;  %v2529_v17 = vld [vmem:[#allocation7 + $0x40] sm:$0xf]  ;;  %v2579_v5 = vld [vmem:[#allocation7 + $0xb0] sm:$0xf0] }
 0x1b5   :  { %v2530_v29 = vor.u32 %v3230_v18, %v2529_v17  ;;  %v3268_v17 = vld [vmem:[#allocation7 + $0x184] sm:$0xf]  ;;  %v2691_v18 = vld [vmem:[#allocation7 + $0x190] sm:$0xf0] }
 0x1b6   :  { %v3635_v27 = vpack.c.bf16 %v335_v23, %v335_v23  ;;  %v3637_v38 = vpack.c.bf16 %v336_v24, %v336_v24  ;;  %v2785_v23 = vld [vmem:[#allocation7 + $0x240] sm:$0xf]  ;;  %v2930_v24 = vor.u32 %v3330_v15, %v2929_v14  ;;  %v3232_v14 = vld [vmem:[#allocation7 + $0x64] sm:$0xf]  ;;  %v2547_v15 = vld [vmem:[#allocation7 + $0x70] sm:$0xf0] }
 0x1b7   :  { %v318_v32 = vpop.f32.mrf.mxu2  ;;  %v331_v33 = vpop.f32.mrf.mxu3  ;;  %v2786_v35 = vor.u32 %v3294_v25, %v2785_v23  ;;  %v2881_v25 = vld [vmem:[#allocation7 + $0x300] sm:$0xf] }
 0x1b8   :  { %735 = vmatmul.bf16.vlgmr.msrb.gmra.mxu0 %v3635_v27  ;;  %748 = vmatmul.bf16.vlgmr.msrb.gmra.mxu1 %v3637_v38  ;;  %v2658_v32 = vor.u32 %v3262_v21, %v2657_v20  ;;  %v2641_v33 = vld [vmem:[#allocation7 + $0x120] sm:$0xf]  ;;  %v3228_v20 = vld [vmem:[#allocation7 + $0x44] sm:$0xf]  ;;  %v2531_v21 = vld [vmem:[#allocation7 + $0x50] sm:$0xf0] }
 0x1b9   :  { %761 = vmatmul.bf16.vlgmr.msrb.gmra.mxu2 %v3635_v27  ;;  %774 = vmatmul.bf16.vlgmr.msrb.gmra.mxu3 %v3637_v38  ;;  %v2534_v23 = vor.u32 %v3228_v20, %v2531_v21  ;;  %v3320_v20 = vld [vmem:[#allocation7 + $0x324] sm:$0xf]  ;;  %v2899_v21 = vld [vmem:[#allocation7 + $0x330] sm:$0xf0] }
 0x1ba   :  { %1615 = vmatpush.bf16.msrb.mxu0 %v2610_v28  ;;  %1628 = vmatpush.bf16.msrb.mxu1 %v2738_v31  ;;  %v3326_v28 = vld [vmem:[#allocation7 + $0x34c] sm:$0xf0] }
 0x1bb   :  { %1641 = vmatpush.bf16.msrb.mxu2 %v2866_v36  ;;  %1654 = vmatpush.bf16.msrb.mxu3 %v2994_v39  ;;  %v3226_v31 = vld [vmem:[#allocation7 + $0x2c] sm:$0xf0]  ;;  %v2769_v36 = vld [vmem:[#allocation7 + $0x220] sm:$0xf]  ;;  %v2914_v37 = vor.u32 %v3326_v28, %v2913_v26 }
 0x1bc   :  { %v3290_v39 = vld [vmem:[#allocation7 + $0x22c] sm:$0xf0] }
 0x1bd   :  { %v2770_v47 = vor.u32 %v3290_v39, %v2769_v36  ;;  %v3318_v26 = vld [vmem:[#allocation7 + $0x30c] sm:$0xf0]  ;;  %v3224_v36 = vld [vmem:[#allocation7 + $0x24] sm:$0xf] }
 0x1be   :  { %1616 = vmatpush.bf16.msrb.mxu0 %v2594_v43  ;;  %1629 = vmatpush.bf16.msrb.mxu1 %v2722_v46  ;;  %v2642_v43 = vor.u32 %v3258_v34, %v2641_v33  ;;  %v3254_v46 = vld [vmem:[#allocation7 + $0x10c] sm:$0xf0]  ;;  %v2995_v34 = vld [vmem:[#allocation7 + $0x3f0] sm:$0xf0]  ;;  %v3304_v39 = vld [vmem:[#allocation7 + $0x2a4] sm:$0xf] }
 0x1bf   :  { %1642 = vmatpush.bf16.msrb.mxu2 %v2850_v49  ;;  %1655 = vmatpush.bf16.msrb.mxu3 %v2978_v51  ;;  %v2611_v49 = vld [vmem:[#allocation7 + $0xf0] sm:$0xf0] }
 0x1c0   :  { %v2739_v51 = vld [vmem:[#allocation7 + $0x1f0] sm:$0xf0] }
 0x1c1   :  { %v2742_v60 = vor.u32 %v3280_v50, %v2739_v51  ;;  %v2819_v51 = vld [vmem:[#allocation7 + $0x290] sm:$0xf0] }
 0x1c2   :  { %1617 = vmatpush.bf16.msrb.mxu0 %v2578_v55  ;;  %1630 = vmatpush.bf16.msrb.mxu1 %v2706_v58  ;;  %v2626_v55 = vor.u32 %v3254_v46, %v2625_v45  ;;  %v2614_v58 = vor.u32 %v3248_v44, %v2611_v49  ;;  %v3340_v44 = vld [vmem:[#allocation7 + $0x3c4] sm:$0xf]  ;;  %v2979_v45 = vld [vmem:[#allocation7 + $0x3d0] sm:$0xf0] }
 0x1c3   :  { %1643 = vmatpush.bf16.msrb.mxu2 %v2834_v61  ;;  %1656 = vmatpush.bf16.msrb.mxu3 %v2962_v63  ;;  %v2595_v61 = vld [vmem:[#allocation7 + $0xd0] sm:$0xf0]  ;;  %v2982_v46 = vor.u32 %v3340_v44, %v2979_v45  ;;  %v3300_v49 = vld [vmem:[#allocation7 + $0x284] sm:$0xf]  ;;  %v2601_v44 = vld [vmem:[#allocation7 + $0xc8] sm:$0xf] }
 0x1c4   :  { %v2723_v63 = vld [vmem:[#allocation7 + $0x1d0] sm:$0xf0]  ;;  %v2598_v2 = vor.u32 %v3244_v59, %v2595_v61  ;;  %v2822_v52 = vor.u32 %v3300_v49, %v2819_v51  ;;  %v3296_v59 = vld [vmem:[#allocation7 + $0x264] sm:$0xf]  ;;  %v3247_v45 = vld [vmem:[#allocation7 + $0xd4] sm:$0xf0] }
 0x1c5   :  { %v2726_v4 = vor.u32 %v3276_v62, %v2723_v63  ;;  %v3252_v62 = vld [vmem:[#allocation7 + $0x104] sm:$0xf]  ;;  %v2627_v63 = vld [vmem:[#allocation7 + $0x110] sm:$0xf0]  ;;  %v2745_v49 = vld [vmem:[#allocation7 + $0x1e8] sm:$0xf] }
 0x1c6   :  { %1618 = vmatpush.bf16.msrb.mxu0 %v2562_v3  ;;  %1631 = vmatpush.bf16.msrb.mxu1 %v2690_v6  ;;  %v3240_v3 = vld [vmem:[#allocation7 + $0xa4] sm:$0xf] }
 0x1c7   :  { %1644 = vmatpush.bf16.msrb.mxu2 %v2818_v10  ;;  %1657 = vmatpush.bf16.msrb.mxu3 %v2946_v12  ;;  %v3272_v6 = vld [vmem:[#allocation7 + $0x1a4] sm:$0xf]  ;;  %v2582_v9 = vor.u32 %v3240_v3, %v2579_v5  ;;  %v2563_v12 = vld [vmem:[#allocation7 + $0x90] sm:$0xf0] }
 0x1c8   :  { %787 = vmatmul.bf16.vlgmr.msra.gmra.mxu0 %v3635_v27  ;;  %800 = vmatmul.bf16.vlgmr.msra.gmra.mxu1 %v3637_v38  ;;  %v2710_v10 = vor.u32 %v3272_v6, %v2707_v7  ;;  %v2566_v13 = vor.u32 %v3236_v11, %v2563_v12  ;;  %v2787_v5 = vld [vmem:[#allocation7 + $0x250] sm:$0xf0]  ;;  %v3328_v7 = vld [vmem:[#allocation7 + $0x364] sm:$0xf] }
 0x1c9   :  { %813 = vmatmul.bf16.vlgmr.msra.gmra.mxu2 %v3635_v27  ;;  %826 = vmatmul.bf16.vlgmr.msra.gmra.mxu3 %v3637_v38  ;;  %v2514_v27 = vor.u32 %v3226_v31, %v2513_v30  ;;  %v2497_v38 = vld [vmem:[#allocation7] sm:$0xf]  ;;  %v3264_v30 = vld [vmem:[#allocation7 + $0x164] sm:$0xf]  ;;  %v2675_v31 = vld [vmem:[#allocation7 + $0x170] sm:$0xf0] }
 0x1ca   :  { %1619 = vmatpush.bf16.msrb.mxu0 %v2546_v16  ;;  %1632 = vmatpush.bf16.msrb.mxu1 %v2674_v19  ;;  %v2498_v54 = vor.u32 %v3222_v42, %v2497_v38  ;;  %v2550_v16 = vor.u32 %v3232_v14, %v2547_v15  ;;  %v2694_v19 = vor.u32 %v3268_v17, %v2691_v18  ;;  %v3260_v38 = vld [vmem:[#allocation7 + $0x144] sm:$0xf]  ;;  %v2659_v42 = vld [vmem:[#allocation7 + $0x150] sm:$0xf0] }
 0x1cb   :  { %1645 = vmatpush.bf16.msrb.mxu2 %v2802_v22  ;;  %1658 = vmatpush.bf16.msrb.mxu3 %v2930_v24  ;;  %v3308_v22 = vld [vmem:[#allocation7 + $0x2c4] sm:$0xf]  ;;  %v2851_v24 = vld [vmem:[#allocation7 + $0x2d0] sm:$0xf0]  ;;  %v2678_v33 = vor.u32 %v3264_v30, %v2675_v31 }
 0x1cc   :  { %v2854_v28 = vor.u32 %v3308_v22, %v2851_v24  ;;  %v3288_v11 = vld [vmem:[#allocation7 + $0x224] sm:$0xf]  ;;  %v2771_v12 = vld [vmem:[#allocation7 + $0x230] sm:$0xf0]  ;;  %v2902_v22 = vor.u32 %v3320_v20, %v2899_v21 }
 0x1cd   :  { %v3324_v14 = vld [vmem:[#allocation7 + $0x344] sm:$0xf]  ;;  %v2915_v15 = vld [vmem:[#allocation7 + $0x350] sm:$0xf0] }
 0x1ce   :  { %1620 = vmatpush.bf16.msrb.mxu0 %v2530_v29  ;;  %1633 = vmatpush.bf16.msrb.mxu1 %v2658_v32  ;;  %v2882_v29 = vor.u32 %v3318_v26, %v2881_v25  ;;  %v3344_v32 = vld [vmem:[#allocation7 + $0x3e4] sm:$0xf]  ;;  %v2755_v18 = vld [vmem:[#allocation7 + $0x210] sm:$0xf0] }
 0x1cf   :  { %1646 = vmatpush.bf16.msrb.mxu2 %v2786_v35  ;;  %1659 = vmatpush.bf16.msrb.mxu3 %v2914_v37  ;;  %v2998_v35 = vor.u32 %v3344_v32, %v2995_v34  ;;  %v2515_v37 = vld [vmem:[#allocation7 + $0x30] sm:$0xf0]  ;;  %v3284_v17 = vld [vmem:[#allocation7 + $0x204] sm:$0xf] }
 0x1d0   :  { %v2518_v40 = vor.u32 %v3224_v36, %v2515_v37  ;;  %v3316_v25 = vld [vmem:[#allocation7 + $0x304] sm:$0xf]  ;;  %v2883_v26 = vld [vmem:[#allocation7 + $0x310] sm:$0xf0]  ;;  %v3251_v36 = vld [vmem:[#allocation7 + $0xf4] sm:$0xf0] }
 0x1d1   :  { %v2886_v30 = vor.u32 %v3316_v25, %v2883_v26  ;;  %v2697_v25 = vld [vmem:[#allocation7 + $0x188] sm:$0xf]  ;;  %v3271_v26 = vld [vmem:[#allocation7 + $0x194] sm:$0xf0] }
 0x1d2   :  { %1621 = vmatpush.bf16.msrb.mxu0 %v2514_v27  ;;  %1634 = vmatpush.bf16.msrb.mxu1 %v2642_v43  ;;  %v2838_v27 = vor.u32 %v3304_v39, %v2835_v41  ;;  %v2662_v43 = vor.u32 %v3260_v38, %v2659_v42 }
 0x1d3   :  { %1647 = vmatpush.bf16.msrb.mxu2 %v2770_v47  ;;  %1660 = vmatpush.bf16.msrb.mxu3 %v2898_v48  ;;  %v3220_v47 = vld [vmem:[#allocation7 + $0x4] sm:$0xf]  ;;  %v2499_v48 = vld [vmem:[#allocation7 + $0x10] sm:$0xf0] }
 0x1d4   :  { %v2502_v50 = vor.u32 %v3220_v47, %v2499_v48  ;;  %v3653_v47 = vld [vmem:[#allocation10 + $0x10] sm:$0xff]  ;;  %v2602_v48 = vor.u32 %v3247_v45, %v2601_v44  ;;  %v3307_v44 = vld [vmem:[#allocation7 + $0x2b4] sm:$0xf0] }
 0x1d5   :  { %v405_v51 = vperm.slane %v3653_v47, 3 }
 0x1d6   :  { %1622 = vmatpush.bf16.msrb.mxu0 %v2498_v54  ;;  %1635 = vmatpush.bf16.msrb.mxu1 %v2626_v55  ;;  %v2643_v54 = vld [vmem:[#allocation7 + $0x130] sm:$0xf0]  ;;  %v3336_v55 = vld [vmem:[#allocation7 + $0x3a4] sm:$0xf] }
 0x1d7   :  { %1648 = vmatpush.bf16.msrb.mxu2 %v2754_v0  ;;  %1661 = vmatpush.bf16.msrb.mxu3 %v2882_v29  ;;  %v2646_v56 = vor.u32 %v3256_v53, %v2643_v54  ;;  %v3332_v0 = vld [vmem:[#allocation7 + $0x384] sm:$0xf]  ;;  %v3243_v53 = vld [vmem:[#allocation7 + $0xb4] sm:$0xf0] }
 0x1da   :  { %1667 = vmatpush.bf16.msra.mxu0 %v2614_v58  ;;  %1680 = vmatpush.bf16.msra.mxu1 %v2742_v60  ;;  %v2966_v58 = vor.u32 %v3336_v55, %v2963_v57  ;;  %v2803_v60 = vld [vmem:[#allocation7 + $0x270] sm:$0xf0] }
 0x1db   :  { %1693 = vmatpush.bf16.msra.mxu2 %v2870_v1  ;;  %1706 = vmatpush.bf16.msra.mxu3 %v2998_v35  ;;  %v2806_v61 = vor.u32 %v3296_v59, %v2803_v60  ;;  %v2630_v1 = vor.u32 %v3252_v62, %v2627_v63  ;;  %v2617_v35 = vld [vmem:[#allocation7 + $0xe8] sm:$0xf]  ;;  %v3279_v63 = vld [vmem:[#allocation7 + $0x1d4] sm:$0xf0] }
 0x1dc   :  { %v2618_v42 = vor.u32 %v3251_v36, %v2617_v35  ;;  %v2729_v62 = vld [vmem:[#allocation7 + $0x1c8] sm:$0xf]  ;;  %v2698_v35 = vor.u32 %v3271_v26, %v2697_v25  ;;  %v3281_v25 = vld [vmem:[#allocation7 + $0x1ec] sm:$0xf]  ;;  %v2747_v26 = vld [vmem:[#allocation7 + $0x1f8] sm:$0xf0] }
 0x1dd   :  { %v2681_v36 = vld [vmem:[#allocation7 + $0x168] sm:$0xf] }
 0x1de   :  { %1668 = vmatpush.bf16.msra.mxu0 %v2598_v2  ;;  %1681 = vmatpush.bf16.msra.mxu1 %v2726_v4  ;;  %v2947_v2 = vld [vmem:[#allocation7 + $0x390] sm:$0xf0]  ;;  %v3292_v4 = vld [vmem:[#allocation7 + $0x244] sm:$0xf] }
 0x1df   :  { %1694 = vmatpush.bf16.msra.mxu2 %v2854_v28  ;;  %1707 = vmatpush.bf16.msra.mxu3 %v2982_v46  ;;  %v2950_v3 = vor.u32 %v3332_v0, %v2947_v2  ;;  %v2790_v6 = vor.u32 %v3292_v4, %v2787_v5  ;;  %v2569_v2 = vld [vmem:[#allocation7 + $0x88] sm:$0xf]  ;;  %v2730_v5 = vor.u32 %v3279_v63, %v2729_v62  ;;  %v3223_v63 = vld [vmem:[#allocation7 + $0x14] sm:$0xf0] }
 0x1e0   :  { %v2505_v62 = vld [vmem:[#allocation7 + $0x8] sm:$0xf] }
 0x1e2   :  { %1669 = vmatpush.bf16.msra.mxu0 %v2582_v9  ;;  %1682 = vmatpush.bf16.msra.mxu1 %v2710_v10  ;;  %v2931_v9 = vld [vmem:[#allocation7 + $0x370] sm:$0xf0] }
 0x1e3   :  { %1695 = vmatpush.bf16.msra.mxu2 %v2838_v27  ;;  %1708 = vmatpush.bf16.msra.mxu3 %v2966_v58  ;;  %v2934_v10 = vor.u32 %v3328_v7, %v2931_v9  ;;  %v2713_v9 = vld [vmem:[#allocation7 + $0x1a8] sm:$0xf] }
 0x1e6   :  { %1670 = vmatpush.bf16.msra.mxu0 %v2566_v13  ;;  %1683 = vmatpush.bf16.msra.mxu1 %v2694_v19  ;;  %v2774_v13 = vor.u32 %v3288_v11, %v2771_v12  ;;  %v2758_v19 = vor.u32 %v3284_v17, %v2755_v18  ;;  %v2873_v12 = vld [vmem:[#allocation7 + $0x2e8] sm:$0xf] }
 0x1e7   :  { %1696 = vmatpush.bf16.msra.mxu2 %v2822_v52  ;;  %1709 = vmatpush.bf16.msra.mxu3 %v2950_v3  ;;  %v2585_v52 = vld [vmem:[#allocation7 + $0xa8] sm:$0xf]  ;;  %v3239_v3 = vld [vmem:[#allocation7 + $0x94] sm:$0xf0] }
 0x1e8   :  { %v2570_v7 = vor.u32 %v3239_v3, %v2569_v2  ;;  %v3249_v3 = vld [vmem:[#allocation7 + $0xec] sm:$0xf] }
 0x1ea   :  { %1671 = vmatpush.bf16.msra.mxu0 %v2550_v16  ;;  %1684 = vmatpush.bf16.msra.mxu1 %v2678_v33  ;;  %v2918_v16 = vor.u32 %v3324_v14, %v2915_v15  ;;  %v404_v33 = vperm.slane %v3631_v8, 3  ;;  %v2553_v14 = vld [vmem:[#allocation7 + $0x68] sm:$0xf]  ;;  %v3235_v15 = vld [vmem:[#allocation7 + $0x74] sm:$0xf0] }
 0x1eb   :  { %1697 = vmatpush.bf16.msra.mxu2 %v2806_v61  ;;  %1710 = vmatpush.bf16.msra.mxu3 %v2934_v10  ;;  %v2586_v61 = vor.u32 %v3243_v53, %v2585_v52  ;;  %v3275_v10 = vld [vmem:[#allocation7 + $0x1b4] sm:$0xf0]  ;;  %v2665_v52 = vld [vmem:[#allocation7 + $0x148] sm:$0xf] }
 0x1ee   :  { %1672 = vmatpush.bf16.msra.mxu0 %v2534_v23  ;;  %1685 = vmatpush.bf16.msra.mxu1 %v2662_v43  ;;  %v3647_v23 = vld [vmem:[#allocation10] sm:$0xff] }
 0x1ef   :  { %1698 = vmatpush.bf16.msra.mxu2 %v2790_v6  ;;  %1711 = vmatpush.bf16.msra.mxu3 %v2918_v16  ;;  %v403_v24 = vperm.slane %v3647_v23, 3 }
 0x1f2   :  { %1673 = vmatpush.bf16.msra.mxu0 %v2518_v40  ;;  %1686 = vmatpush.bf16.msra.mxu1 %v2646_v56 }
 0x1f3   :  { %1699 = vmatpush.bf16.msra.mxu2 %v2774_v13  ;;  %1712 = vmatpush.bf16.msra.mxu3 %v2902_v22  ;;  %v3315_v13 = vld [vmem:[#allocation7 + $0x2f4] sm:$0xf0] }
 0x1f6   :  { %1674 = vmatpush.bf16.msra.mxu0 %v2502_v50  ;;  %1687 = vmatpush.bf16.msra.mxu1 %v2630_v1  ;;  %v3283_v50 = vld [vmem:[#allocation7 + $0x1f4] sm:$0xf0] }
 0x1f7   :  { %1700 = vmatpush.bf16.msra.mxu2 %v2758_v19  ;;  %1713 = vmatpush.bf16.msra.mxu3 %v2886_v30  ;;  %v2746_v57 = vor.u32 %v3283_v50, %v2745_v49  ;;  %v3659_v1 = vld [vmem:[#allocation10 + $0x18] sm:$0xff]  ;;  %v2714_v19 = vor.u32 %v3275_v10, %v2713_v9  ;;  %v2857_v30 = vld [vmem:[#allocation7 + $0x2c8] sm:$0xf] }
 0x1f8   :  { %v406_v6 = vperm.slane %v3659_v1, 3  ;;  %v2969_v9 = vld [vmem:[#allocation7 + $0x3a8] sm:$0xf]  ;;  %v3339_v10 = vld [vmem:[#allocation7 + $0x3b4] sm:$0xf0] }
 0x235   :  { %v736_v28 = vpop.f32.mrf.mxu0  ;;  %v749_v29 = vpop.f32.mrf.mxu1 }
 0x236   :  { %v737_v31 = vadd.f32 %v736_v28, %v403_v24  ;;  %v2874_v24 = vor.u32 %v3315_v13, %v2873_v12  ;;  %v2809_v13 = vld [vmem:[#allocation7 + $0x268] sm:$0xf] }
 0x238   :  { %v750_v32 = vadd.f32 %v749_v29, %v737_v31  ;;  %v2554_v29 = vor.u32 %v3235_v15, %v2553_v14  ;;  %v3311_v31 = vld [vmem:[#allocation7 + $0x2d4] sm:$0xf0] }
 0x239   :  { %v3299_v14 = vld [vmem:[#allocation7 + $0x274] sm:$0xf0] }
 0x23a   :  { %v831_v34 = vmax.f32 %v750_v32, 0.0 }
 0x23c   :  { %v835_v37 = vmin.f32 %v831_v34, 6.0  ;;  %v762_v39 = vpop.f32.mrf.mxu2  ;;  %v775_v40 = vpop.f32.mrf.mxu3  ;;  %v3231_v34 = vld [vmem:[#allocation7 + $0x54] sm:$0xf0] }
 0x23d   :  { %v763_v41 = vadd.f32 %v762_v39, %v404_v33  ;;  %v738_v27 = vpop.f32.mrf.mxu0  ;;  %v751_v38 = vpop.f32.mrf.mxu1  ;;  %v2537_v33 = vld [vmem:[#allocation7 + $0x48] sm:$0xf] }
 0x23e   :  { %v3651_v43 = vpack.c.bf16 %v835_v37, %v835_v37  ;;  %v3267_v37 = vld [vmem:[#allocation7 + $0x174] sm:$0xf0]  ;;  %v2538_v38 = vor.u32 %v3231_v34, %v2537_v33  ;;  %v3241_v34 = vld [vmem:[#allocation7 + $0xac] sm:$0xf] }
 0x23f   :  { %v776_v46 = vadd.f32 %v775_v40, %v763_v41  ;;  %v2858_v40 = vor.u32 %v3311_v31, %v2857_v30  ;;  %v3001_v41 = vld [vmem:[#allocation7 + $0x3e8] sm:$0xf]  ;;  %v3347_v27 = vld [vmem:[#allocation7 + $0x3f4] sm:$0xf0]  ;;  %v2682_v50 = vor.u32 %v3267_v37, %v2681_v36  ;;  %v2750_v36 = vor.u32 %v3281_v25, %v2747_v26  ;;  %v3225_v25 = vld [vmem:[#allocation7 + $0x2c] sm:$0xf] }
 0x240   :  { %1623 = vmatmul.bf16.vlgmr.msrb.gmra.mxu0 %v3651_v43  ;;  %v2793_v30 = vld [vmem:[#allocation7 + $0x248] sm:$0xf]  ;;  %v3295_v31 = vld [vmem:[#allocation7 + $0x254] sm:$0xf0] }
 0x241   :  { %v832_v8 = vmax.f32 %v776_v46, 0.0  ;;  %1719 = vmatpush.bf16.msrb.mxu0 %v2618_v42  ;;  %v2841_v42 = vld [vmem:[#allocation7 + $0x2a8] sm:$0xf] }
 0x242   :  { %v2521_v46 = vld [vmem:[#allocation7 + $0x28] sm:$0xf] }
 0x243   :  { %v836_v54 = vmin.f32 %v832_v8, 6.0  ;;  %v3227_v8 = vld [vmem:[#allocation7 + $0x34] sm:$0xf0]  ;;  %v2937_v37 = vld [vmem:[#allocation7 + $0x368] sm:$0xf] }
 0x244   :  { %v764_v55 = vpop.f32.mrf.mxu2  ;;  %v777_v56 = vpop.f32.mrf.mxu3 }
 0x245   :  { %v3657_v58 = vpack.c.bf16 %v836_v54, %v836_v54  ;;  %1720 = vmatpush.bf16.msrb.mxu0 %v2602_v48  ;;  %v788_v59 = vpop.f32.mrf.mxu0  ;;  %v801_v60 = vpop.f32.mrf.mxu1  ;;  %v2842_v54 = vor.u32 %v3307_v44, %v2841_v42  ;;  %v3263_v55 = vld [vmem:[#allocation7 + $0x154] sm:$0xf0]  ;;  %v2985_v56 = vld [vmem:[#allocation7 + $0x3c8] sm:$0xf] }
 0x246   :  { %v789_v0 = vadd.f32 %v788_v59, %v405_v51  ;;  %v3002_v51 = vor.u32 %v3347_v27, %v3001_v41  ;;  %v2522_v59 = vor.u32 %v3227_v8, %v2521_v46  ;;  %v3277_v41 = vld [vmem:[#allocation7 + $0x1cc] sm:$0xf]  ;;  %v2731_v27 = vld [vmem:[#allocation7 + $0x1d8] sm:$0xf0]  ;;  %v2777_v42 = vld [vmem:[#allocation7 + $0x228] sm:$0xf] }
 0x247   :  { %1636 = vmatmul.bf16.vlgmr.msrb.gmra.mxu1 %v3657_v58  ;;  %v3291_v44 = vld [vmem:[#allocation7 + $0x234] sm:$0xf0]  ;;  %v3237_v46 = vld [vmem:[#allocation7 + $0x8c] sm:$0xf]  ;;  %v2571_v8 = vld [vmem:[#allocation7 + $0x98] sm:$0xf0] }
 0x248   :  { %v802_v4 = vadd.f32 %v801_v60, %v789_v0  ;;  %1732 = vmatpush.bf16.msrb.mxu1 %v2746_v57  ;;  %v3343_v57 = vld [vmem:[#allocation7 + $0x3d4] sm:$0xf0]  ;;  %v2825_v60 = vld [vmem:[#allocation7 + $0x288] sm:$0xf]  ;;  %v2666_v0 = vor.u32 %v3263_v55, %v2665_v52  ;;  %v3273_v52 = vld [vmem:[#allocation7 + $0x1ac] sm:$0xf]  ;;  %v2574_v55 = vor.u32 %v3237_v46, %v2571_v8 }
 0x249   :  { %1721 = vmatpush.bf16.msrb.mxu0 %v2586_v61  ;;  %v3303_v61 = vld [vmem:[#allocation7 + $0x294] sm:$0xf0]  ;;  %v2986_v2 = vor.u32 %v3343_v57, %v2985_v56  ;;  %v2761_v56 = vld [vmem:[#allocation7 + $0x208] sm:$0xf]  ;;  %v3257_v46 = vld [vmem:[#allocation7 + $0x12c] sm:$0xf] }
 0x24a   :  { %v833_v11 = vmax.f32 %v802_v4, 0.0  ;;  %v2619_v4 = vld [vmem:[#allocation7 + $0xf8] sm:$0xf0]  ;;  %v3287_v57 = vld [vmem:[#allocation7 + $0x214] sm:$0xf0] }
 0x24b   :  { %v2622_v12 = vor.u32 %v3249_v3, %v2619_v4  ;;  %v3323_v3 = vld [vmem:[#allocation7 + $0x334] sm:$0xf0]  ;;  %v2762_v4 = vor.u32 %v3287_v57, %v2761_v56  ;;  %v2651_v8 = vld [vmem:[#allocation7 + $0x138] sm:$0xf0]  ;;  %v3253_v57 = vld [vmem:[#allocation7 + $0x10c] sm:$0xf] }
 0x24c   :  { %v837_v16 = vmin.f32 %v833_v11, 6.0  ;;  %1733 = vmatpush.bf16.msrb.mxu1 %v2730_v5  ;;  %v814_v17 = vpop.f32.mrf.mxu2  ;;  %v827_v18 = vpop.f32.mrf.mxu3  ;;  %v2649_v5 = vld [vmem:[#allocation7 + $0x128] sm:$0xf]  ;;  %v2506_v11 = vor.u32 %v3223_v63, %v2505_v62  ;;  %v3313_v62 = vld [vmem:[#allocation7 + $0x2ec] sm:$0xf] }
 0x24d   :  { %v815_v20 = vadd.f32 %v814_v17, %v406_v6  ;;  %1722 = vmatpush.bf16.msrb.mxu0 %v2570_v7  ;;  %v790_v21 = vpop.f32.mrf.mxu0  ;;  %v803_v22 = vpop.f32.mrf.mxu1  ;;  %v2826_v6 = vor.u32 %v3303_v61, %v2825_v60  ;;  %v3259_v7 = vld [vmem:[#allocation7 + $0x134] sm:$0xf0]  ;;  %v3245_v17 = vld [vmem:[#allocation7 + $0xcc] sm:$0xf]  ;;  %v2555_v61 = vld [vmem:[#allocation7 + $0x78] sm:$0xf0] }
 0x24e   :  { %v3663_v28 = vpack.c.bf16 %v837_v16, %v837_v16  ;;  %v2650_v15 = vor.u32 %v3259_v7, %v2649_v5  ;;  %v2970_v16 = vor.u32 %v3339_v10, %v2969_v9  ;;  %v2953_v21 = vld [vmem:[#allocation7 + $0x388] sm:$0xf]  ;;  %v3335_v22 = vld [vmem:[#allocation7 + $0x394] sm:$0xf0]  ;;  %v2875_v63 = vld [vmem:[#allocation7 + $0x2f8] sm:$0xf0] }
 0x24f   :  { %v828_v32 = vadd.f32 %v827_v18, %v815_v20  ;;  %v2603_v18 = vld [vmem:[#allocation7 + $0xd8] sm:$0xf0]  ;;  %v3255_v20 = vld [vmem:[#allocation7 + $0x114] sm:$0xf0]  ;;  %v2954_v33 = vor.u32 %v3335_v22, %v2953_v21  ;;  %v3269_v5 = vld [vmem:[#allocation7 + $0x18c] sm:$0xf]  ;;  %v2878_v9 = vor.u32 %v3313_v62, %v2875_v63 }
 0x250   :  { %1734 = vmatpush.bf16.msrb.mxu1 %v2714_v19  ;;  %1649 = vmatmul.bf16.vlgmr.msrb.gmra.mxu2 %v3663_v28  ;;  %v2633_v19 = vld [vmem:[#allocation7 + $0x108] sm:$0xf]  ;;  %v3229_v10 = vld [vmem:[#allocation7 + $0x4c] sm:$0xf]  ;;  %v3003_v21 = vld [vmem:[#allocation7 + $0x3f8] sm:$0xf0] }
 0x251   :  { %v834_v39 = vmax.f32 %v828_v32, 0.0  ;;  %1675 = vmatmul.bf16.vlgmr.msra.gmra.mxu0 %v3651_v43  ;;  %1745 = vmatpush.bf16.msrb.mxu2 %v2874_v24  ;;  %v2810_v24 = vor.u32 %v3299_v14, %v2809_v13  ;;  %v2634_v32 = vor.u32 %v3255_v20, %v2633_v19  ;;  %v3309_v13 = vld [vmem:[#allocation7 + $0x2cc] sm:$0xf]  ;;  %v2859_v14 = vld [vmem:[#allocation7 + $0x2d8] sm:$0xf0] }
 0x252   :  { %1723 = vmatpush.bf16.msrb.mxu0 %v2554_v29  ;;  %v2606_v29 = vor.u32 %v3245_v17, %v2603_v18  ;;  %v3319_v17 = vld [vmem:[#allocation7 + $0x314] sm:$0xf0]  ;;  %v3265_v18 = vld [vmem:[#allocation7 + $0x16c] sm:$0xf]  ;;  %v2683_v19 = vld [vmem:[#allocation7 + $0x178] sm:$0xf0] }
 0x253   :  { %v838_v45 = vmin.f32 %v834_v39, 6.0  ;;  %v3331_v39 = vld [vmem:[#allocation7 + $0x374] sm:$0xf0]  ;;  %v3345_v20 = vld [vmem:[#allocation7 + $0x3ec] sm:$0xf] }
 0x254   :  { %1735 = vmatpush.bf16.msrb.mxu1 %v2698_v35  ;;  %v816_v48 = vpop.f32.mrf.mxu2  ;;  %v829_v49 = vpop.f32.mrf.mxu3  ;;  %v2587_v35 = vld [vmem:[#allocation7 + $0xb8] sm:$0xf0]  ;;  %v3293_v63 = vld [vmem:[#allocation7 + $0x24c] sm:$0xf] }
 0x255   :  { %v3667_v53 = vpack.c.bf16 %v838_v45, %v838_v45  ;;  %1746 = vmatpush.bf16.msrb.mxu2 %v2858_v40  ;;  %v2794_v40 = vor.u32 %v3295_v31, %v2793_v30  ;;  %v2938_v45 = vor.u32 %v3331_v39, %v2937_v37  ;;  %v2734_v48 = vor.u32 %v3277_v41, %v2731_v27  ;;  %v2921_v49 = vld [vmem:[#allocation7 + $0x348] sm:$0xf]  ;;  %v3305_v30 = vld [vmem:[#allocation7 + $0x2ac] sm:$0xf]  ;;  %v2843_v31 = vld [vmem:[#allocation7 + $0x2b8] sm:$0xf0] }
 0x256   :  { %1724 = vmatpush.bf16.msrb.mxu0 %v2538_v38  ;;  %v2590_v38 = vor.u32 %v3241_v34, %v2587_v35  ;;  %v3261_v34 = vld [vmem:[#allocation7 + $0x14c] sm:$0xf]  ;;  %v2667_v35 = vld [vmem:[#allocation7 + $0x158] sm:$0xf0] }
 0x257   :  { %1662 = vmatmul.bf16.vlgmr.msrb.gmra.mxu3 %v3667_v53  ;;  %1688 = vmatmul.bf16.vlgmr.msra.gmra.mxu1 %v3657_v58  ;;  %v2987_v37 = vld [vmem:[#allocation7 + $0x3d8] sm:$0xf0]  ;;  %v3221_v41 = vld [vmem:[#allocation7 + $0xc] sm:$0xf] }
 0x258   :  { %1736 = vmatpush.bf16.msrb.mxu1 %v2682_v50  ;;  %1758 = vmatpush.bf16.msrb.mxu3 %v3002_v51  ;;  %v3327_v50 = vld [vmem:[#allocation7 + $0x354] sm:$0xf0]  ;;  %v2778_v51 = vor.u32 %v3291_v44, %v2777_v42  ;;  %v2507_v27 = vld [vmem:[#allocation7 + $0x18] sm:$0xf0]  ;;  %v2670_v44 = vor.u32 %v3261_v34, %v2667_v35  ;;  %v3360_v35 = vld [vmem:[#allocation9 + $0x60] sm:$0xff] }
 0x259   :  { %1747 = vmatpush.bf16.msrb.mxu2 %v2842_v54  ;;  %v2715_v54 = vld [vmem:[#allocation7 + $0x1b8] sm:$0xf0]  ;;  %v2922_v60 = vor.u32 %v3327_v50, %v2921_v49  ;;  %v2510_v50 = vor.u32 %v3221_v41, %v2507_v27  ;;  %v3358_v41 = vld [vmem:[#allocation9 + $0x50] sm:$0xff] }
 0x25a   :  { %1725 = vmatpush.bf16.msrb.mxu0 %v2522_v59  ;;  %v3233_v59 = vld [vmem:[#allocation7 + $0x6c] sm:$0xf]  ;;  %v2827_v42 = vld [vmem:[#allocation7 + $0x298] sm:$0xf0]  ;;  %v3370_v27 = vld [vmem:[#allocation9 + $0xb0] sm:$0xff] }
 0x25b   :  { %v2558_v7 = vor.u32 %v3233_v59, %v2555_v61  ;;  %v2971_v49 = vld [vmem:[#allocation7 + $0x3b8] sm:$0xf0] }
 0x25c   :  { %1737 = vmatpush.bf16.msrb.mxu1 %v2666_v0  ;;  %1759 = vmatpush.bf16.msrb.mxu3 %v2986_v2  ;;  %v2718_v0 = vor.u32 %v3273_v52, %v2715_v54  ;;  %v2905_v2 = vld [vmem:[#allocation7 + $0x328] sm:$0xf]  ;;  %v3297_v52 = vld [vmem:[#allocation7 + $0x26c] sm:$0xf]  ;;  %v2811_v54 = vld [vmem:[#allocation7 + $0x278] sm:$0xf0] }
 0x25d   :  { %1748 = vmatpush.bf16.msrb.mxu2 %v2826_v6  ;;  %v2699_v6 = vld [vmem:[#allocation7 + $0x198] sm:$0xf0]  ;;  %v2814_v62 = vor.u32 %v3297_v52, %v2811_v54  ;;  %v3366_v54 = vld [vmem:[#allocation9 + $0x90] sm:$0xff] }
 0x25e   :  { %1726 = vmatpush.bf16.msrb.mxu0 %v2506_v11  ;;  %v2906_v11 = vor.u32 %v3323_v3, %v2905_v2  ;;  %v2635_v59 = vld [vmem:[#allocation7 + $0x118] sm:$0xf0] }
 0x25f   :  { %v2955_v61 = vld [vmem:[#allocation7 + $0x398] sm:$0xf0]  ;;  %v2638_v2 = vor.u32 %v3253_v57, %v2635_v59 }
 0x260   :  { %1738 = vmatpush.bf16.msrb.mxu1 %v2650_v15  ;;  %1760 = vmatpush.bf16.msrb.mxu3 %v2970_v16  ;;  %v2702_v15 = vor.u32 %v3269_v5, %v2699_v6  ;;  %v2889_v16 = vld [vmem:[#allocation7 + $0x308] sm:$0xf]  ;;  %v2939_v5 = vld [vmem:[#allocation7 + $0x378] sm:$0xf0] }
 0x261   :  { %1701 = vmatmul.bf16.vlgmr.msra.gmra.mxu2 %v3663_v28  ;;  %1727 = vmatmul.bf16.vlgmr.msrb.gmra.mxu0 %v3651_v43  ;;  %v2890_v26 = vor.u32 %v3319_v17, %v2889_v16  ;;  %v2907_v17 = vld [vmem:[#allocation7 + $0x338] sm:$0xf0] }
 0x262   :  { %1771 = vmatpush.bf16.msra.mxu0 %v2622_v12  ;;  %1749 = vmatpush.bf16.msrb.mxu2 %v2810_v24  ;;  %v2539_v12 = vld [vmem:[#allocation7 + $0x58] sm:$0xf0]  ;;  %v2862_v24 = vor.u32 %v3309_v13, %v2859_v14  ;;  %v3285_v14 = vld [vmem:[#allocation7 + $0x20c] sm:$0xf] }
 0x263   :  { %v2542_v22 = vor.u32 %v3229_v10, %v2539_v12  ;;  %v2923_v12 = vld [vmem:[#allocation7 + $0x358] sm:$0xf0] }
 0x264   :  { %1739 = vmatpush.bf16.msrb.mxu1 %v2634_v32  ;;  %1761 = vmatpush.bf16.msrb.mxu3 %v2954_v33  ;;  %v2686_v32 = vor.u32 %v3265_v18, %v2683_v19  ;;  %v3006_v33 = vor.u32 %v3345_v20, %v3003_v21  ;;  %v3317_v20 = vld [vmem:[#allocation7 + $0x30c] sm:$0xf]  ;;  %v2891_v21 = vld [vmem:[#allocation7 + $0x318] sm:$0xf0] }
 0x266   :  { %1772 = vmatpush.bf16.msra.mxu0 %v2606_v29  ;;  %1750 = vmatpush.bf16.msrb.mxu2 %v2794_v40  ;;  %v2523_v29 = vld [vmem:[#allocation7 + $0x38] sm:$0xf0]  ;;  %v2846_v40 = vor.u32 %v3305_v30, %v2843_v31  ;;  %v3350_v31 = vld [vmem:[#allocation9 + $0x10] sm:$0xff] }
 0x267   :  { %1714 = vmatmul.bf16.vlgmr.msra.gmra.mxu3 %v3667_v53  ;;  %1740 = vmatmul.bf16.vlgmr.msrb.gmra.mxu1 %v3657_v58  ;;  %v2526_v39 = vor.u32 %v3225_v25, %v2523_v29  ;;  %v3353_v25 = vld [vmem:[#allocation9 + $0x28] sm:$0xff]  ;;  %v3351_v29 = vld [vmem:[#allocation9 + $0x18] sm:$0xff] }
 0x268   :  { %1784 = vmatpush.bf16.msra.mxu1 %v2750_v36  ;;  %1762 = vmatpush.bf16.msrb.mxu3 %v2938_v45  ;;  %v3341_v36 = vld [vmem:[#allocation7 + $0x3cc] sm:$0xf]  ;;  %v3363_v30 = vld [vmem:[#allocation9 + $0x78] sm:$0xff] }
 0x269   :  { %v2990_v45 = vor.u32 %v3341_v36, %v2987_v37  ;;  %v3359_v36 = vld [vmem:[#allocation9 + $0x58] sm:$0xff] }
 0x26a   :  { %1773 = vmatpush.bf16.msra.mxu0 %v2590_v38  ;;  %1751 = vmatpush.bf16.msrb.mxu2 %v2778_v51  ;;  %v3301_v38 = vld [vmem:[#allocation7 + $0x28c] sm:$0xf]  ;;  %v3371_v37 = vld [vmem:[#allocation9 + $0xb8] sm:$0xff] }
 0x26b   :  { %v2830_v51 = vor.u32 %v3301_v38, %v2827_v42  ;;  %v3357_v38 = vld [vmem:[#allocation9 + $0x48] sm:$0xff] }
 0x26c   :  { %1785 = vmatpush.bf16.msra.mxu1 %v2734_v48  ;;  %1763 = vmatpush.bf16.msrb.mxu3 %v2922_v60  ;;  %v3337_v48 = vld [vmem:[#allocation7 + $0x3ac] sm:$0xf] }
 0x26d   :  { %v2974_v56 = vor.u32 %v3337_v48, %v2971_v49  ;;  %v3333_v60 = vld [vmem:[#allocation7 + $0x38c] sm:$0xf]  ;;  %v971_v48 = vperm.slane %v3647_v23, 4 }
 0x26e   :  { %1774 = vmatpush.bf16.msra.mxu0 %v2574_v55  ;;  %1752 = vmatpush.bf16.msrb.mxu2 %v2762_v4  ;;  %v2654_v55 = vor.u32 %v3257_v46, %v2651_v8  ;;  %v2958_v3 = vor.u32 %v3333_v60, %v2955_v61  ;;  %v3329_v4 = vld [vmem:[#allocation7 + $0x36c] sm:$0xf]  ;;  %v3356_v46 = vld [vmem:[#allocation9 + $0x40] sm:$0xff] }
 0x26f   :  { %v2942_v10 = vor.u32 %v3329_v4, %v2939_v5  ;;  %v3369_v42 = vld [vmem:[#allocation9 + $0xa8] sm:$0xff]  ;;  %v3368_v8 = vld [vmem:[#allocation9 + $0xa0] sm:$0xff]  ;;  %v3379_v5 = vld [vmem:[#allocation9 + $0xf8] sm:$0xff] }
 0x270   :  { %1786 = vmatpush.bf16.msra.mxu1 %v2718_v0  ;;  %1764 = vmatpush.bf16.msrb.mxu3 %v2906_v11  ;;  %v2795_v0 = vld [vmem:[#allocation7 + $0x258] sm:$0xf0]  ;;  %v3325_v11 = vld [vmem:[#allocation7 + $0x34c] sm:$0xf]  ;;  %v3364_v4 = vld [vmem:[#allocation9 + $0x80] sm:$0xff] }
 0x271   :  { %1753 = vmatmul.bf16.vlgmr.msrb.gmra.mxu2 %v3663_v28  ;;  %v2798_v6 = vor.u32 %v3293_v63, %v2795_v0  ;;  %v2926_v16 = vor.u32 %v3325_v11, %v2923_v12  ;;  %v3378_v11 = vld [vmem:[#allocation9 + $0xf0] sm:$0xff] }
 0x272   :  { %1775 = vmatpush.bf16.msra.mxu0 %v2558_v7  ;;  %1797 = vmatpush.bf16.msra.mxu2 %v2878_v9  ;;  %v3289_v7 = vld [vmem:[#allocation7 + $0x22c] sm:$0xf]  ;;  %v2779_v9 = vld [vmem:[#allocation7 + $0x238] sm:$0xf0] }
 0x273   :  { %v2782_v13 = vor.u32 %v3289_v7, %v2779_v9 }
 0x274   :  { %1787 = vmatpush.bf16.msra.mxu1 %v2702_v15  ;;  %1765 = vmatpush.bf16.msrb.mxu3 %v2890_v26  ;;  %v2763_v15 = vld [vmem:[#allocation7 + $0x218] sm:$0xf0]  ;;  %v3352_v26 = vld [vmem:[#allocation9 + $0x20] sm:$0xff] }
 0x275   :  { %v2766_v18 = vor.u32 %v3285_v14, %v2763_v15 }
 0x276   :  { %1776 = vmatpush.bf16.msra.mxu0 %v2542_v22  ;;  %1798 = vmatpush.bf16.msra.mxu2 %v2862_v24  ;;  %v2894_v22 = vor.u32 %v3317_v20, %v2891_v21  ;;  %v3354_v24 = vld [vmem:[#allocation9 + $0x30] sm:$0xff] }
 0x277   :  { %1766 = vmatmul.bf16.vlgmr.msrb.gmra.mxu3 %v3667_v53 }
 0x278   :  { %1788 = vmatpush.bf16.msra.mxu1 %v2686_v32  ;;  %1810 = vmatpush.bf16.msra.mxu3 %v3006_v33  ;;  %v3362_v32 = vld [vmem:[#allocation9 + $0x70] sm:$0xff]  ;;  %v3361_v33 = vld [vmem:[#allocation9 + $0x68] sm:$0xff] }
 0x27a   :  { %1777 = vmatpush.bf16.msra.mxu0 %v2526_v39  ;;  %1799 = vmatpush.bf16.msra.mxu2 %v2846_v40 }
 0x27c   :  { %1789 = vmatpush.bf16.msra.mxu1 %v2670_v44  ;;  %1811 = vmatpush.bf16.msra.mxu3 %v2990_v45 }
 0x27e   :  { %1778 = vmatpush.bf16.msra.mxu0 %v2510_v50  ;;  %1800 = vmatpush.bf16.msra.mxu2 %v2830_v51  ;;  %v3367_v50 = vld [vmem:[#allocation9 + $0x98] sm:$0xff] }
 0x280   :  { %1790 = vmatpush.bf16.msra.mxu1 %v2654_v55  ;;  %1812 = vmatpush.bf16.msra.mxu3 %v2974_v56 }
 0x281   :  { %1779 = vmatmul.bf16.vlgmr.msra.gmra.mxu0 %v3651_v43  ;;  %v3321_v43 = vld [vmem:[#allocation7 + $0x32c] sm:$0xf] }
 0x282   :  { %1801 = vmatpush.bf16.msra.mxu2 %v2814_v62  ;;  %v2910_v19 = vor.u32 %v3321_v43, %v2907_v17  ;;  %v3365_v62 = vld [vmem:[#allocation9 + $0x88] sm:$0xff] }
 0x283   :  { %v3377_v43 = vld [vmem:[#allocation9 + $0xe8] sm:$0xff] }
 0x284   :  { %1791 = vmatpush.bf16.msra.mxu1 %v2638_v2  ;;  %1813 = vmatpush.bf16.msra.mxu3 %v2958_v3 }
 0x286   :  { %1802 = vmatpush.bf16.msra.mxu2 %v2798_v6  ;;  %v3393_v6 = vld [vmem:[#allocation10 + $0x8] sm:$0xff] }
 0x287   :  { %1792 = vmatmul.bf16.vlgmr.msra.gmra.mxu1 %v3657_v58  ;;  %v3355_v58 = vld [vmem:[#allocation9 + $0x38] sm:$0xff]  ;;  %v972_v7 = vperm.slane %v3393_v6, 4 }
 0x288   :  { %1814 = vmatpush.bf16.msra.mxu3 %v2942_v10  ;;  %2092 = vmatpush.bf16.msrb.mxu0 %v3355_v58 }
 0x289   :  { %2105 = vmatpush.bf16.msrb.mxu1 %v3363_v30 }
 0x28a   :  { %1803 = vmatpush.bf16.msra.mxu2 %v2782_v13 }
 0x28c   :  { %1815 = vmatpush.bf16.msra.mxu3 %v2926_v16  ;;  %2093 = vmatpush.bf16.msrb.mxu0 %v3354_v24 }
 0x28d   :  { %2106 = vmatpush.bf16.msrb.mxu1 %v3362_v32 }
 0x28e   :  { %1804 = vmatpush.bf16.msra.mxu2 %v2766_v18  ;;  %v3376_v18 = vld [vmem:[#allocation9 + $0xe0] sm:$0xff] }
 0x290   :  { %1816 = vmatpush.bf16.msra.mxu3 %v2910_v19  ;;  %2094 = vmatpush.bf16.msrb.mxu0 %v3353_v25  ;;  %v3375_v25 = vld [vmem:[#allocation9 + $0xd8] sm:$0xff] }
 0x291   :  { %1805 = vmatmul.bf16.vlgmr.msra.gmra.mxu2 %v3663_v28  ;;  %v3349_v28 = vld [vmem:[#allocation9 + $0x8] sm:$0xff]  ;;  %2107 = vmatpush.bf16.msrb.mxu1 %v3361_v33 }
 0x292   :  { %2118 = vmatpush.bf16.msrb.mxu2 %v3371_v37  ;;  %v3373_v33 = vld [vmem:[#allocation9 + $0xc8] sm:$0xff]  ;;  %v3372_v37 = vld [vmem:[#allocation9 + $0xc0] sm:$0xff] }
 0x294   :  { %1817 = vmatpush.bf16.msra.mxu3 %v2894_v22  ;;  %2095 = vmatpush.bf16.msrb.mxu0 %v3352_v26 }
 0x295   :  { %2108 = vmatpush.bf16.msrb.mxu1 %v3360_v35 }
 0x296   :  { %2119 = vmatpush.bf16.msrb.mxu2 %v3370_v27 }
 0x297   :  { %1818 = vmatmul.bf16.vlgmr.msra.gmra.mxu3 %v3667_v53  ;;  %v3348_v53 = vld [vmem:[#allocation9] sm:$0xff] }
 0x298   :  { %2096 = vmatpush.bf16.msrb.mxu0 %v3351_v29  ;;  %2131 = vmatpush.bf16.msrb.mxu3 %v3379_v5  ;;  %v973_v29 = vperm.slane %v3653_v47, 4 }
 0x299   :  { %2109 = vmatpush.bf16.msrb.mxu1 %v3359_v36 }
 0x29a   :  { %2120 = vmatpush.bf16.msrb.mxu2 %v3369_v42 }
 0x29c   :  { %2097 = vmatpush.bf16.msrb.mxu0 %v3350_v31  ;;  %2132 = vmatpush.bf16.msrb.mxu3 %v3378_v11  ;;  %v3374_v31 = vld [vmem:[#allocation9 + $0xd0] sm:$0xff] }
 0x29d   :  { %2110 = vmatpush.bf16.msrb.mxu1 %v3358_v41 }
 0x29e   :  { %2121 = vmatpush.bf16.msrb.mxu2 %v3368_v8 }
 0x2a0   :  { %2098 = vmatpush.bf16.msrb.mxu0 %v3349_v28  ;;  %2133 = vmatpush.bf16.msrb.mxu3 %v3377_v43 }
 0x2a1   :  { %2111 = vmatpush.bf16.msrb.mxu1 %v3357_v38 }
 0x2a2   :  { %2122 = vmatpush.bf16.msrb.mxu2 %v3367_v50 }
 0x2a4   :  { %2099 = vmatpush.bf16.msrb.mxu0 %v3348_v53  ;;  %2134 = vmatpush.bf16.msrb.mxu3 %v3376_v18 }
 0x2a5   :  { %2112 = vmatpush.bf16.msrb.mxu1 %v3356_v46  ;;  %v974_v46 = vperm.slane %v3659_v1, 4  ;;  %v1899_v1 = vperm.slane %v3647_v23, 5 }
 0x2a6   :  { %2123 = vmatpush.bf16.msrb.mxu2 %v3366_v54 }
 0x2a8   :  { %2135 = vmatpush.bf16.msrb.mxu3 %v3375_v25 }
 0x2aa   :  { %2124 = vmatpush.bf16.msrb.mxu2 %v3365_v62 }
 0x2ac   :  { %2136 = vmatpush.bf16.msrb.mxu3 %v3374_v31 }
 0x2ae   :  { %2125 = vmatpush.bf16.msrb.mxu2 %v3364_v4 }
 0x2b0   :  { %2137 = vmatpush.bf16.msrb.mxu3 %v3373_v33 }
 0x2b4   :  { %2138 = vmatpush.bf16.msrb.mxu3 %v3372_v37 }
 0x2bd   :  { %v1624_v34 = vpop.f32.mrf.mxu0 }
 0x2be   :  { %v1625_v52 = vadd.f32 %v1624_v34, %v971_v48 }
 0x2c4   :  { %v1637_v39 = vpop.f32.mrf.mxu1 }
 0x2c5   :  { %v1626_v40 = vpop.f32.mrf.mxu0  ;;  %v1638_v56 = vadd.f32 %v1637_v39, %v1625_v52 }
 0x2cc   :  { %v1639_v44 = vpop.f32.mrf.mxu1 }
 0x2ce   :  { %v1676_v45 = vpop.f32.mrf.mxu0 }
 0x2cf   :  { %v1677_v13 = vadd.f32 %v1676_v45, %v972_v7 }
 0x2d3   :  { %v1650_v49 = vpop.f32.mrf.mxu2 }
 0x2d4   :  { %v1689_v51 = vpop.f32.mrf.mxu1  ;;  %v1651_v57 = vadd.f32 %v1650_v49, %v1638_v56 }
 0x2d5   :  { %v1690_v16 = vadd.f32 %v1689_v51, %v1677_v13 }
 0x2d6   :  { %v1678_v55 = vpop.f32.mrf.mxu0 }
 0x2da   :  { %v1663_v59 = vpop.f32.mrf.mxu3 }
 0x2db   :  { %v1664_v60 = vadd.f32 %v1663_v59, %v1651_v57  ;;  %v1652_v61 = vpop.f32.mrf.mxu2 }
 0x2dc   :  { %v1691_v63 = vpop.f32.mrf.mxu1 }
 0x2dd   :  { %v1823_v0 = vmax.f32 %v1664_v60, 0.0 }
 0x2de   :  { %v1728_v2 = vpop.f32.mrf.mxu0 }
 0x2df   :  { %v1827_v3 = vmin.f32 %v1823_v0, 6.0  ;;  %v1729_v28 = vadd.f32 %v1728_v2, %v973_v29 }
 0x2e1   :  { %v1831_v9 = vpack.c.bf16 %v1827_v3, %v1827_v3 }
 0x2e2   :  { %v1665_v10 = vpop.f32.mrf.mxu3 }
 0x2e3   :  { %2100 = vmatmul.bf16.vlgmr.msrb.gmra.mxu0 %v1831_v9 }
 0x2e4   :  { %v1702_v12 = vpop.f32.mrf.mxu2  ;;  %v1741_v14 = vpop.f32.mrf.mxu1 }
 0x2e5   :  { %v1703_v17 = vadd.f32 %v1702_v12, %v1690_v16  ;;  %v1742_v34 = vadd.f32 %v1741_v14, %v1729_v28 }
 0x2e6   :  { %v1730_v15 = vpop.f32.mrf.mxu0 }
 0x2ea   :  { %v1715_v19 = vpop.f32.mrf.mxu3 }
 0x2eb   :  { %v1716_v20 = vadd.f32 %v1715_v19, %v1703_v17 }
 0x2ec   :  { %v1704_v21 = vpop.f32.mrf.mxu2  ;;  %v1743_v58 = vpop.f32.mrf.mxu1 }
 0x2ed   :  { %v1824_v22 = vmax.f32 %v1716_v20, 0.0 }
 0x2ef   :  { %v1828_v24 = vmin.f32 %v1824_v22, 6.0 }
 0x2f1   :  { %v1832_v26 = vpack.c.bf16 %v1828_v24, %v1828_v24 }
 0x2f2   :  { %v1717_v30 = vpop.f32.mrf.mxu3 }
 0x2f3   :  { %2113 = vmatmul.bf16.vlgmr.msrb.gmra.mxu1 %v1832_v26 }
 0x2f4   :  { %v1754_v32 = vpop.f32.mrf.mxu2 }
 0x2f5   :  { %v1755_v53 = vadd.f32 %v1754_v32, %v1742_v34 }
 0x2fa   :  { %v1767_v35 = vpop.f32.mrf.mxu3 }
 0x2fb   :  { %v1768_v39 = vadd.f32 %v1767_v35, %v1755_v53 }
 0x2fc   :  { %v1756_v40 = vpop.f32.mrf.mxu2 }
 0x2fd   :  { %v1825_v41 = vmax.f32 %v1768_v39, 0.0 }
 0x2fe   :  { %v1780_v36 = vpop.f32.mrf.mxu0 }
 0x2ff   :  { %v1829_v27 = vmin.f32 %v1825_v41, 6.0  ;;  %v1781_v48 = vadd.f32 %v1780_v36, %v974_v46 }
 0x301   :  { %v1833_v47 = vpack.c.bf16 %v1829_v27, %v1829_v27 }
 0x302   :  { %v1769_v42 = vpop.f32.mrf.mxu3 }
 0x303   :  { %2126 = vmatmul.bf16.vlgmr.msrb.gmra.mxu2 %v1833_v47 }
 0x304   :  { %v1793_v38 = vpop.f32.mrf.mxu1 }
 0x305   :  { %v1794_v49 = vadd.f32 %v1793_v38, %v1781_v48 }
 0x306   :  { %v1782_v44 = vpop.f32.mrf.mxu0 }
 0x30c   :  { %v1795_v45 = vpop.f32.mrf.mxu1 }
 0x314   :  { %v1806_v8 = vpop.f32.mrf.mxu2 }
 0x315   :  { %v1807_v50 = vadd.f32 %v1806_v8, %v1794_v49 }
 0x31a   :  { %v1819_v51 = vpop.f32.mrf.mxu3 }
 0x31b   :  { %v1820_v52 = vadd.f32 %v1819_v51, %v1807_v50 }
 0x31c   :  { %v1808_v54 = vpop.f32.mrf.mxu2 }
 0x31d   :  { %v1826_v55 = vmax.f32 %v1820_v52, 0.0 }
 0x31f   :  { %v1830_v56 = vmin.f32 %v1826_v55, 6.0 }
 0x321   :  { %v1834_v57 = vpack.c.bf16 %v1830_v56, %v1830_v56 }
 0x322   :  { %v1821_v59 = vpop.f32.mrf.mxu3 }
 0x323   :  { %2139 = vmatmul.bf16.vlgmr.msrb.gmra.mxu3 %v1834_v57 }
 0x360   :  { %v2101_v60 = vpop.f32.mrf.mxu0 }
 0x361   :  { %v2102_v3 = vadd.f32 %v2101_v60, %v1899_v1 }
 0x368   :  { %v2103_v61 = vpop.f32.mrf.mxu0 }
 0x370   :  { %v2114_v62 = vpop.f32.mrf.mxu1 }
 0x371   :  { %v2115_v4 = vadd.f32 %v2114_v62, %v2102_v3 }
 0x378   :  { %v2116_v63 = vpop.f32.mrf.mxu1 }
 0x386   :  { %v2127_v0 = vpop.f32.mrf.mxu2 }
 0x387   :  { %v2128_v5 = vadd.f32 %v2127_v0, %v2115_v4 }
 0x38e   :  { %v2129_v2 = vpop.f32.mrf.mxu2 }
 0x3a6   :  { %v2140_v6 = vpop.f32.mrf.mxu3 }
 0x3a7   :  { %v2141_v7 = vadd.f32 %v2140_v6, %v2128_v5 }
 0x3a9   :  { %2144 = vst [vmem:[%s3696_s8] sm:$0xff] %v2141_v7 }
 0x3ae   :  { %v2142_v9 = vpop.f32.mrf.mxu3 }
 0x3af   :  { %2149 = vsyncpa [#allocation3], 1 }
 0x3b0   :  { %2150 = vsyncpa [#allocation5], 1 }
 0x3b1   :  { %2151 = vsyncpa [#allocation8], 1 }
 0x3b2   :  { %2152 = vsyncpa [#allocation11], 1 }

</bundles_post_ra>
